<compile_context>
chip_gen: v7x
topology: tpu7x:2x2x1
jax: 0.10.0
libtpu: 0.0.40
codegen_flags: <defaults>
</compile_context>

<pallas_src>
import functools

import numpy as np

import jax
import jax.numpy as jnp
from jax.experimental import pallas as pl
from jax.experimental.pallas import tpu as pltpu


# ----------------------------------------------------------------------------
# One-time host-side weight re-layout (numpy; runs once at init, not per call)
# ----------------------------------------------------------------------------
def _stride2_layer_mats(wt, bias, hin, win, tile_b, *, in_rows_hb):
    """ConvTranspose2d(k=4, s=2, p=1) -> (R, L, bias_row).

    wt: [Cin, Cout, 4, 4] (PyTorch layout).
    R:  [Win*Cin, 4*WCpad]     right matmul; lane block ky maps (w,ci)->(ox,co):
        R[(w,ci), (ky,ox,co)] = wt[ci,co,ky,kx] with kx = ox+1-2w if 0<=kx<4.
    L:  [4, Hout*tb, Hin*tb]   per-ky 0/1 left matmuls (col2im along H):
        L[ky, (b,oy), col] = 1 iff oy == 2h-1+ky, where col is (h,b) if the
        layer's input rows are (h,b)-ordered (layer 2) else (b,h).
        Output rows are always (b, oy).
    bias_row: [1, WCpad]       bias tiled over ox, lane-padded to 128 multiple.
    """
    cin, cout = wt.shape[0], wt.shape[1]
    hout, wout = 2 * hin, 2 * win
    lanes = wout * cout
    lane_pad = (-lanes) % 128  # make every ky block a multiple of 128 lanes

    R = np.zeros((win, cin, 4, wout, cout), np.float32)
    for ky in range(4):
        for ox in range(wout):
            for w in range(win):
                kx = ox + 1 - 2 * w
                if 0 <= kx < 4:
                    R[w, :, ky, ox, :] = wt[:, :, ky, kx]
    R = R.reshape(win * cin, 4, lanes)
    brow = np.tile(bias, wout)
    if lane_pad:
        R = np.concatenate([R, np.zeros((win * cin, 4, lane_pad), np.float32)], axis=-1)
        brow = np.concatenate([brow, np.zeros(lane_pad, np.float32)])
    R = R.reshape(win * cin, 4 * (lanes + lane_pad))

    L = np.zeros((4, hout * tile_b, hin * tile_b), np.float32)
    for ky in range(4):
        for oy in range(hout):
            t = oy + 1 - ky
            if t % 2 == 0 and 0 <= t // 2 < hin:
                h = t // 2
                for b in range(tile_b):
                    col = (h * tile_b + b) if in_rows_hb else (b * hin + h)
                    L[ky, b * hout + oy, col] = 1.0

    return R, L, brow.reshape(1, -1)


def prepare_params(params, tile_b):
    """Convert PyTorch-style ConvTranspose2d weights to the matmul-only form
    used by the fused kernel.  tile_b = samples processed per grid step (the
    tiny L matrices bake this block structure in)."""
    def npf(x):
        return np.asarray(x, np.float32)

    w1, b1 = npf(params["w1"]), npf(params["b1"])
    latent, c1 = w1.shape[0], w1.shape[1]
    # tconv1 on a 1x1 input: out[b,co,h,w] = sum_ci z[b,ci]*w1[ci,co,h,w]+b1[co]
    w1_mat = np.transpose(w1, (0, 2, 3, 1)).reshape(latent, 16 * c1)  # cols (h,w,co)
    b1_row = np.tile(b1, 4).reshape(1, -1)                            # lanes (w,co)

    r2, l2, b2 = _stride2_layer_mats(npf(params["w2"]), npf(params["b2"]),
                                     4, 4, tile_b, in_rows_hb=True)
    r3, l3, b3 = _stride2_layer_mats(npf(params["w3"]), npf(params["b3"]),
                                     8, 8, tile_b, in_rows_hb=False)
    r4, l4, b4 = _stride2_layer_mats(npf(params["w4"]), npf(params["b4"]),
                                     16, 16, tile_b, in_rows_hb=False)

    bf = jnp.bfloat16
    return {
        "w1": jnp.asarray(w1_mat, bf), "b1": jnp.asarray(b1_row),
        "r2": jnp.asarray(r2, bf), "l2": jnp.asarray(l2, bf), "b2": jnp.asarray(b2),
        "r3": jnp.asarray(r3, bf), "l3": jnp.asarray(l3, bf), "b3": jnp.asarray(b3),
        "r4": jnp.asarray(r4, bf), "l4": jnp.asarray(l4, bf), "b4": jnp.asarray(b4),
    }


# ----------------------------------------------------------------------------
# The single fused Pallas kernel: whole generator forward in VMEM
# ----------------------------------------------------------------------------
def _generator_kernel(z_ref, w1_ref, b1_ref,
                      r2_ref, l2_ref, b2_ref,
                      l3_ref, b3_ref,
                      l4_ref, b4_ref,
                      r3_hbm, r4_hbm,
                      o_ref,
                      r3_vmem, r4_vmem, dma_sem):
    f32, bf16 = jnp.float32, jnp.bfloat16
    first_step = pl.program_id(0) == 0

    r3_copy = pltpu.make_async_copy(r3_hbm, r3_vmem, dma_sem.at[0])
    r4_copy = pltpu.make_async_copy(r4_hbm, r4_vmem, dma_sem.at[1])

    # Prefetch the tconv3/tconv4 weights (~0.77 MB) so their DMA streams in
    # under the tconv1/tconv2 compute.  Scratch persists across grid steps, so
    # only the first step fetches (grid steps are sequential: "arbitrary").
    @pl.when(first_step)
    def _():
        r3_copy.start()
        r4_copy.start()

    def leaky(x):  # nn.LeakyReLU(0.2)
        return jnp.where(x >= 0.0, x, 0.2 * x)

    # --- stride-2 ConvTranspose2d: matmuls only, no zeros, no im2col --------
    def tconv_s2(a, r, l_ref, b_ref, act):
        # Right matmul (bf16, lane-dense N): channel mixing + col2im along W,
        # one 128-multiple lane block per kernel row ky.
        u = jnp.dot(a.astype(bf16), r, preferred_element_type=f32)
        ub = u.astype(bf16)                     # left matmul is single-pass bf16
        wc = b_ref.shape[1]                     # Wout*Cout (lane padded)
        # Per-ky 0/1 left matmuls: col2im along H (shift + boundary + 2x row
        # interleave).  No sublane re-stack of u; partials accumulate in f32.
        o = jnp.dot(l_ref[0], ub[:, 0:wc], preferred_element_type=f32)
        for k in range(1, 4):
            o = o + jnp.dot(l_ref[k], ub[:, k * wc:(k + 1) * wc],
                            preferred_element_type=f32)
        return act(o + b_ref[...])

    # --- tconv1 (k=4, s=1, p=0 on a 1x1 input == dense layer) ---------------
    y1 = jnp.dot(z_ref[...].astype(bf16), w1_ref[...],
                 preferred_element_type=f32)                       # [tb, 16*C1]
    wc1 = b1_ref.shape[1]                                          # 4*C1
    # Stack the 4 kernel-row lane blocks onto sublanes -> rows (h, b).  L2 was
    # built for (h, b) input rows, so no further reorder is needed.
    a = jnp.concatenate([y1[:, h * wc1:(h + 1) * wc1] for h in range(4)], axis=0)
    a = leaky(a + b1_ref[...])                                     # [4*tb, 4*C1]

    # --- tconv2 --------------------------------------------------------------
    a = tconv_s2(a, r2_ref[...], l2_ref, b2_ref, leaky)            # rows (b, oy)

    # --- tconv3 (weights were prefetched under tconv1/tconv2) ----------------
    @pl.when(first_step)
    def _():
        r3_copy.wait()
    a = tconv_s2(a, r3_vmem[...], l3_ref, b3_ref, leaky)

    # --- tconv4 + tanh --------------------------------------------------------
    @pl.when(first_step)
    def _():
        r4_copy.wait()
    a = tconv_s2(a, r4_vmem[...], l4_ref, b4_ref, jnp.tanh)
    o_ref[...] = a


# ----------------------------------------------------------------------------
# Wrapper: one pallas_call for the whole network
# ----------------------------------------------------------------------------
def generator_forward(inp_nchw, prep, *, img_channels=3):
    """inp_nchw: [B, latent_dim, 1, 1] (or [B, latent_dim]) -> [B, C, 32, 32]."""
    B = inp_nchw.shape[0]
    z = inp_nchw.reshape(B, -1).astype(jnp.float32)
    latent = z.shape[1]

    tile_b = prep["l2"].shape[2] // 4        # batch tile baked into the L mats
    assert B % tile_b == 0, "prepared params were built for a different batch tile"
    assert tile_b == B or tile_b % 8 == 0, "row-tiled grids need tile_b % 8 == 0"
    grid_b = B // tile_b

    hout = prep["l4"].shape[1] // tile_b     # 32
    wout = hout                              # square images
    lanes_out = prep["b4"].shape[1]          # lane-padded Wout*C (= 128)

    def const_spec(arr):
        nd = arr.ndim
        return pl.BlockSpec(arr.shape, lambda i, _n=nd: (0,) * _n)

    in_specs = [
        pl.BlockSpec((tile_b, latent), lambda i: (i, 0)),    # z, tiled over batch
        const_spec(prep["w1"]), const_spec(prep["b1"]),
        const_spec(prep["r2"]), const_spec(prep["l2"]), const_spec(prep["b2"]),
        const_spec(prep["l3"]), const_spec(prep["b3"]),
        const_spec(prep["l4"]), const_spec(prep["b4"]),
        pl.BlockSpec(memory_space=pl.ANY),                   # r3: manual DMA
        pl.BlockSpec(memory_space=pl.ANY),                   # r4: manual DMA
    ]

    # TODO(synk): on v7x a "parallel" batch axis would engage the second
    # TensorCore, but the fetch-once weight prefetch assumes sequential grid
    # steps; keep "arbitrary" here (a no-op at grid=(1,)).
    out2d = pl.pallas_call(
        _generator_kernel,
        out_shape=jax.ShapeDtypeStruct((B * hout, lanes_out), jnp.float32),
        grid=(grid_b,),
        in_specs=in_specs,
        out_specs=pl.BlockSpec((tile_b * hout, lanes_out), lambda i: (i, 0)),
        scratch_shapes=[
            pltpu.VMEM(prep["r3"].shape, prep["r3"].dtype),
            pltpu.VMEM(prep["r4"].shape, prep["r4"].dtype),
            pltpu.SemaphoreType.DMA((2,)),
        ],
        compiler_params=pltpu.CompilerParams(
            dimension_semantics=("arbitrary",)),
        cost_estimate=pl.CostEstimate(flops=25_000_000 * grid_b,
                                      transcendentals=B * hout * lanes_out,
                                      bytes_accessed=2_000_000),
    )(z, prep["w1"], prep["b1"],
      prep["r2"], prep["l2"], prep["b2"],
      prep["l3"], prep["b3"],
      prep["l4"], prep["b4"],
      prep["r3"], prep["r4"])

    # Cheap XLA glue: drop lane padding; rows are (b, oy), lanes (ox, co).
    img = out2d[:, : wout * img_channels].reshape(B, hout, wout, img_channels)
    # grad_reverse: identity in the forward pass (only negates gradients).
    # TODO(synk): wrap with jax.custom_vjp to negate gradients for training parity.
    return jnp.transpose(img, (0, 3, 1, 2))


# ----------------------------------------------------------------------------
# Plain-XLA f32 reference (for the correctness check in __main__)
# ----------------------------------------------------------------------------
def _ref_tconv(x, w, b, stride, padding):
    """x: [B,Cin,H,W]; w: [Cin,Cout,k,k] (PyTorch ConvTranspose2d layout)."""
    k = w.shape[-1]
    w_flip = jnp.transpose(w, (1, 0, 2, 3))[:, :, ::-1, ::-1]   # [Cout,Cin,k,k]
    pad = k - 1 - padding
    y = jax.lax.conv_general_dilated(
        x, w_flip, window_strides=(1, 1),
        padding=((pad, pad), (pad, pad)),
        lhs_dilation=(stride, stride),
        dimension_numbers=("NCHW", "OIHW", "NCHW"))
    return y + b[None, :, None, None]


def generator_reference(inp, params):
    x = inp.reshape(inp.shape[0], -1, 1, 1)
    x = _ref_tconv(x, params["w1"], params["b1"], 1, 0)
    x = jnp.where(x >= 0, x, 0.2 * x)
    x = _ref_tconv(x, params["w2"], params["b2"], 2, 1)
    x = jnp.where(x >= 0, x, 0.2 * x)
    x = _ref_tconv(x, params["w3"], params["b3"], 2, 1)
    x = jnp.where(x >= 0, x, 0.2 * x)
    x = _ref_tconv(x, params["w4"], params["b4"], 2, 1)
    return jnp.tanh(x)


def init_params(key, latent_dim, ngf, img_channels):
    ks = jax.random.split(key, 8)
    scale = 0.05
    shapes = {
        "w1": (latent_dim, ngf * 4, 4, 4), "b1": (ngf * 4,),
        "w2": (ngf * 4, ngf * 2, 4, 4),    "b2": (ngf * 2,),
        "w3": (ngf * 2, ngf, 4, 4),        "b3": (ngf,),
        "w4": (ngf, img_channels, 4, 4),   "b4": (img_channels,),
    }
    params = {}
    for i, (name, shp) in enumerate(shapes.items()):
        params[name] = scale * jax.random.normal(ks[i], shp, dtype=jnp.float32)
    return params


if __name__ == "__main__":
    B, LATENT, NGF, IMG_CH = 2, 32, 16, 3

    key = jax.random.PRNGKey(0)
    k_param, k_in = jax.random.split(key)
    params = init_params(k_param, LATENT, NGF, IMG_CH)
    inp = jax.random.normal(k_in, (B, LATENT, 1, 1), dtype=jnp.float32)

    prep = prepare_params(params, tile_b=B)   # one-time host-side weight re-layout

    fwd = jax.jit(functools.partial(generator_forward, img_channels=IMG_CH))
    out = jax.block_until_ready(fwd(inp, prep))

    assert out.shape == (B, IMG_CH, 32, 32), out.shape
    assert bool(jnp.all(jnp.isfinite(out)))
    assert bool(jnp.all(jnp.abs(out) <= 1.0 + 1e-6))  # tanh range

    # correctness vs. plain-XLA f32 reference (bf16 MXU operands -> loose tol)
    ref = jax.jit(generator_reference)(inp, params)
    err = float(jnp.max(jnp.abs(out - ref)))
    assert err < 5e-2, f"max abs error vs reference: {err}"

    print("KERNEL_OK")
</pallas_src>

<mosaic_0001>
module attributes {stable_mosaic.version = 11 : i64} {
  func.func @_generator_kernel(%arg0: i32, %arg1: memref<2x32xf32, #tpu.memory_space<vmem>>, %arg2: memref<32x1024xbf16, #tpu.memory_space<vmem>>, %arg3: memref<1x256xf32, #tpu.memory_space<vmem>>, %arg4: memref<256x1024xbf16, #tpu.memory_space<vmem>>, %arg5: memref<4x16x8xbf16, #tpu.memory_space<vmem>>, %arg6: memref<1x256xf32, #tpu.memory_space<vmem>>, %arg7: memref<4x32x16xbf16, #tpu.memory_space<vmem>>, %arg8: memref<1x256xf32, #tpu.memory_space<vmem>>, %arg9: memref<4x64x32xbf16, #tpu.memory_space<vmem>>, %arg10: memref<1x128xf32, #tpu.memory_space<vmem>>, %arg11: memref<256x1024xbf16, #tpu.memory_space<any>>, %arg12: memref<256x512xbf16, #tpu.memory_space<any>>, %arg13: memref<64x128xf32, #tpu.memory_space<vmem>>, %arg14: memref<256x1024xbf16, #tpu.memory_space<vmem>>, %arg15: memref<256x512xbf16, #tpu.memory_space<vmem>>, %arg16: memref<2x!tpu.dma_semaphore, #tpu.memory_space<semaphore_mem>>) attributes {dimension_semantics = [#tpu.dimension_semantics<arbitrary>], iteration_bounds = array<i64: 1>, scalar_prefetch = 0 : i64, scratch_operands = 3 : i64, tpu.core_type = #tpu.core_type<tc>, window_params = [{transform_indices = @transform_0, window_bounds = array<i64: 2, 32>}, {pipeline_mode = #tpu.pipeline_mode<synchronous>, transform_indices = @transform_1, window_bounds = array<i64: 32, 1024>}, {pipeline_mode = #tpu.pipeline_mode<synchronous>, transform_indices = @transform_2, window_bounds = array<i64: 1, 256>}, {pipeline_mode = #tpu.pipeline_mode<synchronous>, transform_indices = @transform_3, window_bounds = array<i64: 256, 1024>}, {pipeline_mode = #tpu.pipeline_mode<synchronous>, transform_indices = @transform_4, window_bounds = array<i64: 4, 16, 8>}, {pipeline_mode = #tpu.pipeline_mode<synchronous>, transform_indices = @transform_5, window_bounds = array<i64: 1, 256>}, {pipeline_mode = #tpu.pipeline_mode<synchronous>, transform_indices = @transform_6, window_bounds = array<i64: 4, 32, 16>}, {pipeline_mode = #tpu.pipeline_mode<synchronous>, transform_indices = @transform_7, window_bounds = array<i64: 1, 256>}, {pipeline_mode = #tpu.pipeline_mode<synchronous>, transform_indices = @transform_8, window_bounds = array<i64: 4, 64, 32>}, {pipeline_mode = #tpu.pipeline_mode<synchronous>, transform_indices = @transform_9, window_bounds = array<i64: 1, 128>}, {}, {}, {transform_indices = @transform_12, window_bounds = array<i64: 64, 128>}]} {
    %c0_i32 = arith.constant 0 : i32
    %0 = arith.cmpi eq, %arg0, %c0_i32 : i32
    %1 = arith.extui %0 : i1 to i32
    %c0_i32_0 = arith.constant 0 : i32
    %c1_i32 = arith.constant 1 : i32
    %c0_i32_1 = arith.constant 0 : i32
    %2 = arith.cmpi ne, %1, %c0_i32_1 : i32
    scf.if %2 {
      %114 = tpu.memref_slice %arg16[%c0_i32_0] : memref<2x!tpu.dma_semaphore, #tpu.memory_space<semaphore_mem>> -> memref<1x!tpu.dma_semaphore, #tpu.memory_space<semaphore_mem>>
      %115 = tpu.memref_squeeze %114 : memref<1x!tpu.dma_semaphore, #tpu.memory_space<semaphore_mem>> -> memref<!tpu.dma_semaphore, #tpu.memory_space<semaphore_mem>>
      tpu.enqueue_dma source(%arg11 : memref<256x1024xbf16, #tpu.memory_space<any>>) target(%arg14 : memref<256x1024xbf16, #tpu.memory_space<vmem>>) target_semaphore(%115 : memref<!tpu.dma_semaphore, #tpu.memory_space<semaphore_mem>>)
      %116 = tpu.memref_slice %arg16[%c1_i32] : memref<2x!tpu.dma_semaphore, #tpu.memory_space<semaphore_mem>> -> memref<1x!tpu.dma_semaphore, #tpu.memory_space<semaphore_mem>>
      %117 = tpu.memref_squeeze %116 : memref<1x!tpu.dma_semaphore, #tpu.memory_space<semaphore_mem>> -> memref<!tpu.dma_semaphore, #tpu.memory_space<semaphore_mem>>
      tpu.enqueue_dma source(%arg12 : memref<256x512xbf16, #tpu.memory_space<any>>) target(%arg15 : memref<256x512xbf16, #tpu.memory_space<vmem>>) target_semaphore(%117 : memref<!tpu.dma_semaphore, #tpu.memory_space<semaphore_mem>>)
    } else {
    }
    %c0 = arith.constant 0 : index
    %c0_2 = arith.constant 0 : index
    %3 = vector.load %arg1[%c0, %c0_2] : memref<2x32xf32, #tpu.memory_space<vmem>>, vector<2x32xf32>
    %4 = arith.truncf %3 : vector<2x32xf32> to vector<2x32xbf16>
    %c0_3 = arith.constant 0 : index
    %c0_4 = arith.constant 0 : index
    %5 = vector.load %arg2[%c0_3, %c0_4] : memref<32x1024xbf16, #tpu.memory_space<vmem>>, vector<32x1024xbf16>
    %cst = arith.constant dense<0.000000e+00> : vector<2x1024xf32>
    %6 = tpu.matmul %4, %5, %cst {dimension_numbers = #tpu.dot_dimension_numbers<[1], [0], [0], [1], [0, 0, 1, 1], [], []>} : vector<2x32xbf16>, vector<32x1024xbf16>, vector<2x1024xf32> -> vector<2x1024xf32>
    %7 = vector.extract_strided_slice %6 {offsets = [0, 0], sizes = [2, 256], strides = [1, 1]} : vector<2x1024xf32> to vector<2x256xf32>
    %8 = vector.extract_strided_slice %6 {offsets = [0, 256], sizes = [2, 256], strides = [1, 1]} : vector<2x1024xf32> to vector<2x256xf32>
    %9 = vector.extract_strided_slice %6 {offsets = [0, 512], sizes = [2, 256], strides = [1, 1]} : vector<2x1024xf32> to vector<2x256xf32>
    %10 = vector.extract_strided_slice %6 {offsets = [0, 768], sizes = [2, 256], strides = [1, 1]} : vector<2x1024xf32> to vector<2x256xf32>
    %11 = tpu.concatenate %7, %8, %9, %10 in 0 : vector<2x256xf32>, vector<2x256xf32>, vector<2x256xf32>, vector<2x256xf32> -> vector<8x256xf32>
    %c0_5 = arith.constant 0 : index
    %c0_6 = arith.constant 0 : index
    %12 = vector.load %arg3[%c0_5, %c0_6] : memref<1x256xf32, #tpu.memory_space<vmem>>, vector<1x256xf32>
    %13 = vector.broadcast %12 : vector<1x256xf32> to vector<8x256xf32>
    %14 = arith.addf %11, %13 : vector<8x256xf32>
    %cst_7 = arith.constant 0.000000e+00 : f32
    %15 = vector.broadcast %cst_7 : f32 to vector<8x256xf32>
    %16 = arith.cmpf oge, %14, %15 : vector<8x256xf32>
    %cst_8 = arith.constant 2.000000e-01 : f32
    %17 = vector.broadcast %cst_8 : f32 to vector<8x256xf32>
    %18 = arith.mulf %17, %14 : vector<8x256xf32>
    %19 = arith.select %16, %14, %18 : vector<8x256xi1>, vector<8x256xf32>
    %c0_9 = arith.constant 0 : index
    %c0_10 = arith.constant 0 : index
    %20 = vector.load %arg4[%c0_9, %c0_10] : memref<256x1024xbf16, #tpu.memory_space<vmem>>, vector<256x1024xbf16>
    %21 = arith.truncf %19 : vector<8x256xf32> to vector<8x256xbf16>
    %cst_11 = arith.constant dense<0.000000e+00> : vector<8x1024xf32>
    %22 = tpu.matmul %21, %20, %cst_11 {dimension_numbers = #tpu.dot_dimension_numbers<[1], [0], [0], [1], [0, 0, 1, 1], [], []>} : vector<8x256xbf16>, vector<256x1024xbf16>, vector<8x1024xf32> -> vector<8x1024xf32>
    %23 = arith.truncf %22 : vector<8x1024xf32> to vector<8x1024xbf16>
    %c0_12 = arith.constant 0 : index
    %c0_13 = arith.constant 0 : index
    %c0_14 = arith.constant 0 : index
    %24 = vector.load %arg5[%c0_12, %c0_13, %c0_14] : memref<4x16x8xbf16, #tpu.memory_space<vmem>>, vector<1x16x8xbf16>
    %25 = vector.shape_cast %24 : vector<1x16x8xbf16> to vector<16x8xbf16>
    %26 = vector.extract_strided_slice %23 {offsets = [0, 0], sizes = [8, 256], strides = [1, 1]} : vector<8x1024xbf16> to vector<8x256xbf16>
    %cst_15 = arith.constant dense<0.000000e+00> : vector<16x256xf32>
    %27 = tpu.matmul %25, %26, %cst_15 {dimension_numbers = #tpu.dot_dimension_numbers<[1], [0], [0], [1], [0, 0, 1, 1], [], []>} : vector<16x8xbf16>, vector<8x256xbf16>, vector<16x256xf32> -> vector<16x256xf32>
    %c1 = arith.constant 1 : index
    %c0_16 = arith.constant 0 : index
    %c0_17 = arith.constant 0 : index
    %28 = vector.load %arg5[%c1, %c0_16, %c0_17] : memref<4x16x8xbf16, #tpu.memory_space<vmem>>, vector<1x16x8xbf16>
    %29 = vector.shape_cast %28 : vector<1x16x8xbf16> to vector<16x8xbf16>
    %30 = vector.extract_strided_slice %23 {offsets = [0, 256], sizes = [8, 256], strides = [1, 1]} : vector<8x1024xbf16> to vector<8x256xbf16>
    %cst_18 = arith.constant dense<0.000000e+00> : vector<16x256xf32>
    %31 = tpu.matmul %29, %30, %cst_18 {dimension_numbers = #tpu.dot_dimension_numbers<[1], [0], [0], [1], [0, 0, 1, 1], [], []>} : vector<16x8xbf16>, vector<8x256xbf16>, vector<16x256xf32> -> vector<16x256xf32>
    %32 = arith.addf %27, %31 : vector<16x256xf32>
    %c2 = arith.constant 2 : index
    %c0_19 = arith.constant 0 : index
    %c0_20 = arith.constant 0 : index
    %33 = vector.load %arg5[%c2, %c0_19, %c0_20] : memref<4x16x8xbf16, #tpu.memory_space<vmem>>, vector<1x16x8xbf16>
    %34 = vector.shape_cast %33 : vector<1x16x8xbf16> to vector<16x8xbf16>
    %35 = vector.extract_strided_slice %23 {offsets = [0, 512], sizes = [8, 256], strides = [1, 1]} : vector<8x1024xbf16> to vector<8x256xbf16>
    %cst_21 = arith.constant dense<0.000000e+00> : vector<16x256xf32>
    %36 = tpu.matmul %34, %35, %cst_21 {dimension_numbers = #tpu.dot_dimension_numbers<[1], [0], [0], [1], [0, 0, 1, 1], [], []>} : vector<16x8xbf16>, vector<8x256xbf16>, vector<16x256xf32> -> vector<16x256xf32>
    %37 = arith.addf %32, %36 : vector<16x256xf32>
    %c3 = arith.constant 3 : index
    %c0_22 = arith.constant 0 : index
    %c0_23 = arith.constant 0 : index
    %38 = vector.load %arg5[%c3, %c0_22, %c0_23] : memref<4x16x8xbf16, #tpu.memory_space<vmem>>, vector<1x16x8xbf16>
    %39 = vector.shape_cast %38 : vector<1x16x8xbf16> to vector<16x8xbf16>
    %40 = vector.extract_strided_slice %23 {offsets = [0, 768], sizes = [8, 256], strides = [1, 1]} : vector<8x1024xbf16> to vector<8x256xbf16>
    %cst_24 = arith.constant dense<0.000000e+00> : vector<16x256xf32>
    %41 = tpu.matmul %39, %40, %cst_24 {dimension_numbers = #tpu.dot_dimension_numbers<[1], [0], [0], [1], [0, 0, 1, 1], [], []>} : vector<16x8xbf16>, vector<8x256xbf16>, vector<16x256xf32> -> vector<16x256xf32>
    %42 = arith.addf %37, %41 : vector<16x256xf32>
    %c0_25 = arith.constant 0 : index
    %c0_26 = arith.constant 0 : index
    %43 = vector.load %arg6[%c0_25, %c0_26] : memref<1x256xf32, #tpu.memory_space<vmem>>, vector<1x256xf32>
    %44 = vector.broadcast %43 : vector<1x256xf32> to vector<16x256xf32>
    %45 = arith.addf %42, %44 : vector<16x256xf32>
    %cst_27 = arith.constant 0.000000e+00 : f32
    %46 = vector.broadcast %cst_27 : f32 to vector<16x256xf32>
    %47 = arith.cmpf oge, %45, %46 : vector<16x256xf32>
    %cst_28 = arith.constant 2.000000e-01 : f32
    %48 = vector.broadcast %cst_28 : f32 to vector<16x256xf32>
    %49 = arith.mulf %48, %45 : vector<16x256xf32>
    %50 = arith.select %47, %45, %49 : vector<16x256xi1>, vector<16x256xf32>
    %51 = arith.extui %0 : i1 to i32
    %c0_i32_29 = arith.constant 0 : i32
    %c0_i32_30 = arith.constant 0 : i32
    %52 = arith.cmpi ne, %51, %c0_i32_30 : i32
    scf.if %52 {
      %114 = tpu.memref_slice %arg16[%c0_i32_29] : memref<2x!tpu.dma_semaphore, #tpu.memory_space<semaphore_mem>> -> memref<1x!tpu.dma_semaphore, #tpu.memory_space<semaphore_mem>>
      %115 = tpu.memref_squeeze %114 : memref<1x!tpu.dma_semaphore, #tpu.memory_space<semaphore_mem>> -> memref<!tpu.dma_semaphore, #tpu.memory_space<semaphore_mem>>
      tpu.wait_dma2 semaphore(%115 : memref<!tpu.dma_semaphore, #tpu.memory_space<semaphore_mem>>) src(%arg11 : memref<256x1024xbf16, #tpu.memory_space<any>>) dst(%arg14 : memref<256x1024xbf16, #tpu.memory_space<vmem>>)
    } else {
    }
    %c0_31 = arith.constant 0 : index
    %c0_32 = arith.constant 0 : index
    %53 = vector.load %arg14[%c0_31, %c0_32] : memref<256x1024xbf16, #tpu.memory_space<vmem>>, vector<256x1024xbf16>
    %54 = arith.truncf %50 : vector<16x256xf32> to vector<16x256xbf16>
    %cst_33 = arith.constant dense<0.000000e+00> : vector<16x1024xf32>
    %55 = tpu.matmul %54, %53, %cst_33 {dimension_numbers = #tpu.dot_dimension_numbers<[1], [0], [0], [1], [0, 0, 1, 1], [], []>} : vector<16x256xbf16>, vector<256x1024xbf16>, vector<16x1024xf32> -> vector<16x1024xf32>
    %56 = arith.truncf %55 : vector<16x1024xf32> to vector<16x1024xbf16>
    %c0_34 = arith.constant 0 : index
    %c0_35 = arith.constant 0 : index
    %c0_36 = arith.constant 0 : index
    %57 = vector.load %arg7[%c0_34, %c0_35, %c0_36] : memref<4x32x16xbf16, #tpu.memory_space<vmem>>, vector<1x32x16xbf16>
    %58 = vector.shape_cast %57 : vector<1x32x16xbf16> to vector<32x16xbf16>
    %59 = vector.extract_strided_slice %56 {offsets = [0, 0], sizes = [16, 256], strides = [1, 1]} : vector<16x1024xbf16> to vector<16x256xbf16>
    %cst_37 = arith.constant dense<0.000000e+00> : vector<32x256xf32>
    %60 = tpu.matmul %58, %59, %cst_37 {dimension_numbers = #tpu.dot_dimension_numbers<[1], [0], [0], [1], [0, 0, 1, 1], [], []>} : vector<32x16xbf16>, vector<16x256xbf16>, vector<32x256xf32> -> vector<32x256xf32>
    %c1_38 = arith.constant 1 : index
    %c0_39 = arith.constant 0 : index
    %c0_40 = arith.constant 0 : index
    %61 = vector.load %arg7[%c1_38, %c0_39, %c0_40] : memref<4x32x16xbf16, #tpu.memory_space<vmem>>, vector<1x32x16xbf16>
    %62 = vector.shape_cast %61 : vector<1x32x16xbf16> to vector<32x16xbf16>
    %63 = vector.extract_strided_slice %56 {offsets = [0, 256], sizes = [16, 256], strides = [1, 1]} : vector<16x1024xbf16> to vector<16x256xbf16>
    %cst_41 = arith.constant dense<0.000000e+00> : vector<32x256xf32>
    %64 = tpu.matmul %62, %63, %cst_41 {dimension_numbers = #tpu.dot_dimension_numbers<[1], [0], [0], [1], [0, 0, 1, 1], [], []>} : vector<32x16xbf16>, vector<16x256xbf16>, vector<32x256xf32> -> vector<32x256xf32>
    %65 = arith.addf %60, %64 : vector<32x256xf32>
    %c2_42 = arith.constant 2 : index
    %c0_43 = arith.constant 0 : index
    %c0_44 = arith.constant 0 : index
    %66 = vector.load %arg7[%c2_42, %c0_43, %c0_44] : memref<4x32x16xbf16, #tpu.memory_space<vmem>>, vector<1x32x16xbf16>
    %67 = vector.shape_cast %66 : vector<1x32x16xbf16> to vector<32x16xbf16>
    %68 = vector.extract_strided_slice %56 {offsets = [0, 512], sizes = [16, 256], strides = [1, 1]} : vector<16x1024xbf16> to vector<16x256xbf16>
    %cst_45 = arith.constant dense<0.000000e+00> : vector<32x256xf32>
    %69 = tpu.matmul %67, %68, %cst_45 {dimension_numbers = #tpu.dot_dimension_numbers<[1], [0], [0], [1], [0, 0, 1, 1], [], []>} : vector<32x16xbf16>, vector<16x256xbf16>, vector<32x256xf32> -> vector<32x256xf32>
    %70 = arith.addf %65, %69 : vector<32x256xf32>
    %c3_46 = arith.constant 3 : index
    %c0_47 = arith.constant 0 : index
    %c0_48 = arith.constant 0 : index
    %71 = vector.load %arg7[%c3_46, %c0_47, %c0_48] : memref<4x32x16xbf16, #tpu.memory_space<vmem>>, vector<1x32x16xbf16>
    %72 = vector.shape_cast %71 : vector<1x32x16xbf16> to vector<32x16xbf16>
    %73 = vector.extract_strided_slice %56 {offsets = [0, 768], sizes = [16, 256], strides = [1, 1]} : vector<16x1024xbf16> to vector<16x256xbf16>
    %cst_49 = arith.constant dense<0.000000e+00> : vector<32x256xf32>
    %74 = tpu.matmul %72, %73, %cst_49 {dimension_numbers = #tpu.dot_dimension_numbers<[1], [0], [0], [1], [0, 0, 1, 1], [], []>} : vector<32x16xbf16>, vector<16x256xbf16>, vector<32x256xf32> -> vector<32x256xf32>
    %75 = arith.addf %70, %74 : vector<32x256xf32>
    %c0_50 = arith.constant 0 : index
    %c0_51 = arith.constant 0 : index
    %76 = vector.load %arg8[%c0_50, %c0_51] : memref<1x256xf32, #tpu.memory_space<vmem>>, vector<1x256xf32>
    %77 = vector.broadcast %76 : vector<1x256xf32> to vector<32x256xf32>
    %78 = arith.addf %75, %77 : vector<32x256xf32>
    %cst_52 = arith.constant 0.000000e+00 : f32
    %79 = vector.broadcast %cst_52 : f32 to vector<32x256xf32>
    %80 = arith.cmpf oge, %78, %79 : vector<32x256xf32>
    %cst_53 = arith.constant 2.000000e-01 : f32
    %81 = vector.broadcast %cst_53 : f32 to vector<32x256xf32>
    %82 = arith.mulf %81, %78 : vector<32x256xf32>
    %83 = arith.select %80, %78, %82 : vector<32x256xi1>, vector<32x256xf32>
    %84 = arith.extui %0 : i1 to i32
    %c1_i32_54 = arith.constant 1 : i32
    %c0_i32_55 = arith.constant 0 : i32
    %85 = arith.cmpi ne, %84, %c0_i32_55 : i32
    scf.if %85 {
      %114 = tpu.memref_slice %arg16[%c1_i32_54] : memref<2x!tpu.dma_semaphore, #tpu.memory_space<semaphore_mem>> -> memref<1x!tpu.dma_semaphore, #tpu.memory_space<semaphore_mem>>
      %115 = tpu.memref_squeeze %114 : memref<1x!tpu.dma_semaphore, #tpu.memory_space<semaphore_mem>> -> memref<!tpu.dma_semaphore, #tpu.memory_space<semaphore_mem>>
      tpu.wait_dma2 semaphore(%115 : memref<!tpu.dma_semaphore, #tpu.memory_space<semaphore_mem>>) src(%arg12 : memref<256x512xbf16, #tpu.memory_space<any>>) dst(%arg15 : memref<256x512xbf16, #tpu.memory_space<vmem>>)
    } else {
    }
    %c0_56 = arith.constant 0 : index
    %c0_57 = arith.constant 0 : index
    %86 = vector.load %arg15[%c0_56, %c0_57] : memref<256x512xbf16, #tpu.memory_space<vmem>>, vector<256x512xbf16>
    %87 = arith.truncf %83 : vector<32x256xf32> to vector<32x256xbf16>
    %cst_58 = arith.constant dense<0.000000e+00> : vector<32x512xf32>
    %88 = tpu.matmul %87, %86, %cst_58 {dimension_numbers = #tpu.dot_dimension_numbers<[1], [0], [0], [1], [0, 0, 1, 1], [], []>} : vector<32x256xbf16>, vector<256x512xbf16>, vector<32x512xf32> -> vector<32x512xf32>
    %89 = arith.truncf %88 : vector<32x512xf32> to vector<32x512xbf16>
    %c0_59 = arith.constant 0 : index
    %c0_60 = arith.constant 0 : index
    %c0_61 = arith.constant 0 : index
    %90 = vector.load %arg9[%c0_59, %c0_60, %c0_61] : memref<4x64x32xbf16, #tpu.memory_space<vmem>>, vector<1x64x32xbf16>
    %91 = vector.shape_cast %90 : vector<1x64x32xbf16> to vector<64x32xbf16>
    %92 = vector.extract_strided_slice %89 {offsets = [0, 0], sizes = [32, 128], strides = [1, 1]} : vector<32x512xbf16> to vector<32x128xbf16>
    %cst_62 = arith.constant dense<0.000000e+00> : vector<64x128xf32>
    %93 = tpu.matmul %91, %92, %cst_62 {dimension_numbers = #tpu.dot_dimension_numbers<[1], [0], [0], [1], [0, 0, 1, 1], [], []>} : vector<64x32xbf16>, vector<32x128xbf16>, vector<64x128xf32> -> vector<64x128xf32>
    %c1_63 = arith.constant 1 : index
    %c0_64 = arith.constant 0 : index
    %c0_65 = arith.constant 0 : index
    %94 = vector.load %arg9[%c1_63, %c0_64, %c0_65] : memref<4x64x32xbf16, #tpu.memory_space<vmem>>, vector<1x64x32xbf16>
    %95 = vector.shape_cast %94 : vector<1x64x32xbf16> to vector<64x32xbf16>
    %96 = vector.extract_strided_slice %89 {offsets = [0, 128], sizes = [32, 128], strides = [1, 1]} : vector<32x512xbf16> to vector<32x128xbf16>
    %cst_66 = arith.constant dense<0.000000e+00> : vector<64x128xf32>
    %97 = tpu.matmul %95, %96, %cst_66 {dimension_numbers = #tpu.dot_dimension_numbers<[1], [0], [0], [1], [0, 0, 1, 1], [], []>} : vector<64x32xbf16>, vector<32x128xbf16>, vector<64x128xf32> -> vector<64x128xf32>
    %98 = arith.addf %93, %97 : vector<64x128xf32>
    %c2_67 = arith.constant 2 : index
    %c0_68 = arith.constant 0 : index
    %c0_69 = arith.constant 0 : index
    %99 = vector.load %arg9[%c2_67, %c0_68, %c0_69] : memref<4x64x32xbf16, #tpu.memory_space<vmem>>, vector<1x64x32xbf16>
    %100 = vector.shape_cast %99 : vector<1x64x32xbf16> to vector<64x32xbf16>
    %101 = vector.extract_strided_slice %89 {offsets = [0, 256], sizes = [32, 128], strides = [1, 1]} : vector<32x512xbf16> to vector<32x128xbf16>
    %cst_70 = arith.constant dense<0.000000e+00> : vector<64x128xf32>
    %102 = tpu.matmul %100, %101, %cst_70 {dimension_numbers = #tpu.dot_dimension_numbers<[1], [0], [0], [1], [0, 0, 1, 1], [], []>} : vector<64x32xbf16>, vector<32x128xbf16>, vector<64x128xf32> -> vector<64x128xf32>
    %103 = arith.addf %98, %102 : vector<64x128xf32>
    %c3_71 = arith.constant 3 : index
    %c0_72 = arith.constant 0 : index
    %c0_73 = arith.constant 0 : index
    %104 = vector.load %arg9[%c3_71, %c0_72, %c0_73] : memref<4x64x32xbf16, #tpu.memory_space<vmem>>, vector<1x64x32xbf16>
    %105 = vector.shape_cast %104 : vector<1x64x32xbf16> to vector<64x32xbf16>
    %106 = vector.extract_strided_slice %89 {offsets = [0, 384], sizes = [32, 128], strides = [1, 1]} : vector<32x512xbf16> to vector<32x128xbf16>
    %cst_74 = arith.constant dense<0.000000e+00> : vector<64x128xf32>
    %107 = tpu.matmul %105, %106, %cst_74 {dimension_numbers = #tpu.dot_dimension_numbers<[1], [0], [0], [1], [0, 0, 1, 1], [], []>} : vector<64x32xbf16>, vector<32x128xbf16>, vector<64x128xf32> -> vector<64x128xf32>
    %108 = arith.addf %103, %107 : vector<64x128xf32>
    %c0_75 = arith.constant 0 : index
    %c0_76 = arith.constant 0 : index
    %109 = vector.load %arg10[%c0_75, %c0_76] : memref<1x128xf32, #tpu.memory_space<vmem>>, vector<1x128xf32>
    %110 = vector.broadcast %109 : vector<1x128xf32> to vector<64x128xf32>
    %111 = arith.addf %108, %110 : vector<64x128xf32>
    %112 = math.tanh %111 : vector<64x128xf32>
    %c0_77 = arith.constant 0 : index
    %c0_78 = arith.constant 0 : index
    %113 = vector.load %arg13[%c0_77, %c0_78] : memref<64x128xf32, #tpu.memory_space<vmem>>, vector<64x128xf32>
    tpu.vector_store %arg13[%c0_77, %c0_78], %112 {strides = array<i32>} : memref<64x128xf32, #tpu.memory_space<vmem>>, vector<64x128xf32>,
    return
  }
  func.func @transform_0(%arg0: i32) -> (i32, i32) {
    %c0_i32 = arith.constant 0 : i32
    %c0_i32_0 = arith.constant 0 : i32
    return %arg0, %c0_i32 : i32, i32
  }
  func.func @transform_1(%arg0: i32) -> (i32, i32) {
    %c0_i32 = arith.constant 0 : i32
    %c0_i32_0 = arith.constant 0 : i32
    %c0_i32_1 = arith.constant 0 : i32
    return %c0_i32, %c0_i32_0 : i32, i32
  }
  func.func @transform_2(%arg0: i32) -> (i32, i32) {
    %c0_i32 = arith.constant 0 : i32
    %c0_i32_0 = arith.constant 0 : i32
    %c0_i32_1 = arith.constant 0 : i32
    return %c0_i32, %c0_i32_0 : i32, i32
  }
  func.func @transform_3(%arg0: i32) -> (i32, i32) {
    %c0_i32 = arith.constant 0 : i32
    %c0_i32_0 = arith.constant 0 : i32
    %c0_i32_1 = arith.constant 0 : i32
    return %c0_i32, %c0_i32_0 : i32, i32
  }
  func.func @transform_4(%arg0: i32) -> (i32, i32, i32) {
    %c0_i32 = arith.constant 0 : i32
    %c0_i32_0 = arith.constant 0 : i32
    %c0_i32_1 = arith.constant 0 : i32
    %c0_i32_2 = arith.constant 0 : i32
    return %c0_i32, %c0_i32_0, %c0_i32_1 : i32, i32, i32
  }
  func.func @transform_5(%arg0: i32) -> (i32, i32) {
    %c0_i32 = arith.constant 0 : i32
    %c0_i32_0 = arith.constant 0 : i32
    %c0_i32_1 = arith.constant 0 : i32
    return %c0_i32, %c0_i32_0 : i32, i32
  }
  func.func @transform_6(%arg0: i32) -> (i32, i32, i32) {
    %c0_i32 = arith.constant 0 : i32
    %c0_i32_0 = arith.constant 0 : i32
    %c0_i32_1 = arith.constant 0 : i32
    %c0_i32_2 = arith.constant 0 : i32
    return %c0_i32, %c0_i32_0, %c0_i32_1 : i32, i32, i32
  }
  func.func @transform_7(%arg0: i32) -> (i32, i32) {
    %c0_i32 = arith.constant 0 : i32
    %c0_i32_0 = arith.constant 0 : i32
    %c0_i32_1 = arith.constant 0 : i32
    return %c0_i32, %c0_i32_0 : i32, i32
  }
  func.func @transform_8(%arg0: i32) -> (i32, i32, i32) {
    %c0_i32 = arith.constant 0 : i32
    %c0_i32_0 = arith.constant 0 : i32
    %c0_i32_1 = arith.constant 0 : i32
    %c0_i32_2 = arith.constant 0 : i32
    return %c0_i32, %c0_i32_0, %c0_i32_1 : i32, i32, i32
  }
  func.func @transform_9(%arg0: i32) -> (i32, i32) {
    %c0_i32 = arith.constant 0 : i32
    %c0_i32_0 = arith.constant 0 : i32
    %c0_i32_1 = arith.constant 0 : i32
    return %c0_i32, %c0_i32_0 : i32, i32
  }
  func.func @transform_12(%arg0: i32) -> (i32, i32) {
    %c0_i32 = arith.constant 0 : i32
    %c0_i32_0 = arith.constant 0 : i32
    return %arg0, %c0_i32 : i32, i32
  }
}

</mosaic_0001>

<bundles_post_ra>
// kernel: generator_forward.1
= control target key start
LH: loop header
LB: loop body
LE: loop exit
PB: predicated region body
PF: predicated region fallthrough
CT: control target
= control target key end

     0   :  { %17 = vsyncpa [#allocation6], 0  ;;  %s3487_s21 = smov [#allocation5]   ;;  %s3897_s0 = inlined_call_operand.vmem [shape: f32[2,32], index: 0, kind: input, shape index: {}]   ;;  %s3898_s1 = inlined_call_operand.vmem [shape: bf16[32,1024], index: 1, kind: input, shape index: {}]   ;;  %s3899_s2 = inlined_call_operand.vmem [shape: f32[1,256], index: 2, kind: input, shape index: {}]   ;;  %s3900_s3 = inlined_call_operand.hbm [shape: bf16[256,1024], index: 3, kind: input, shape index: {}]   ;;  %s3901_s4 = inlined_call_operand.vmem [shape: bf16[4,16,8], index: 4, kind: input, shape index: {}]   ;;  %s3902_s5 = inlined_call_operand.vmem [shape: f32[1,256], index: 5, kind: input, shape index: {}]   ;;  %s3903_s6 = inlined_call_operand.vmem [shape: bf16[4,32,16], index: 6, kind: input, shape index: {}]   ;;  %s3904_s7 = inlined_call_operand.vmem [shape: f32[1,256], index: 7, kind: input, shape index: {}]   ;;  %s3905_s8 = inlined_call_operand.vmem [shape: bf16[4,64,32], index: 8, kind: input, shape index: {}]   ;;  %s3906_s9 = inlined_call_operand.vmem [shape: f32[1,128], index: 9, kind: input, shape index: {}]   ;;  %s3907_s10 = inlined_call_operand.hbm [shape: bf16[256,1024], index: 10, kind: input, shape index: {}]   ;;  %s3908_s11 = inlined_call_operand.hbm [shape: bf16[256,512], index: 11, kind: input, shape index: {}]   ;;  %s3909_s12 = inlined_call_operand.vmem [shape: f32[64,128], index: 12, kind: output, shape index: {}]  }
   0x1   :  { %s29_s22 = sshll.u32 %s3487_s21, 4  ;;  %s3459_s25 = scalar_lea.hbm %s3900_s3, 16384  ;;  %s30_s22 = int_to_ptr.vmem [resolvable:$true] %s29_s22 }
   0x2   :  { %p3460_p0 = scmp.ne.s32.totalorder %s3900_s3, %s3459_s25  ;;  %p3463_p1 = scmp.lt.u32.totalorder %s3459_s25, %s3900_s3 }
   0x4   :  { %p3465_p2 = pnand %p3463_p1, %p3460_p0 }
   0x6   :  { %3468 = shalt.err (!%p3465_p2)
}
   0x7   :  { %s3469_s30 = scalar_lea.vmem %s30_s22, 16384  ;;  %p3474_p4 = scmp.lt.s32.totalorder %s30_s22, %s30_s22 }
   0x8   :  { %p3470_p3 = scmp.ne.s32.totalorder %s30_s22, %s3469_s30  ;;  %p3475_p5 = scmp.lt.s32.totalorder %s3469_s30, %s3469_s30 }
   0xa   :  { %p3476_p6 = por %p3475_p5, %p3474_p4 }
   0xc   :  { %p3477_p7 = pnand %p3476_p6, %p3470_p3 }
   0xe   :  { %3480 = shalt.err (!%p3477_p7)
}
   0xf   :  { %s3488_s13 = smov 512   ;;  %s3489_s14 = smov 32  }
  0x10   :  { %35 = dma.hbm_to_vmem [thread:$0]  %s3900_s3, 16384, %s30_s22, [#allocation6], %s3488_s13, %s3488_s13, %s3489_s14  }
  0x11   :  { %3481 = dma.done.wait [#allocation6], 16384  }
  0x12   :  { %3482 = vsyncadd [#allocation6], 4294950912 }
  0x13   :  { %s60_s17 = sld [smem:[#allocation0]]   ;;  %s3490_s18 = smov [#allocation2]   ;;  %v3504_v8 = vmov 0   ;;  %vm224_vm0 = vcmask 261120   ;;  %vm410_vm1 = vcmask 1041408   ;;  %vm413_vm2 = vcmask 1043456  }
  0x14   :  { %s68_s19 = sshll.u32 %s3490_s18, 4  ;;  %s3491_s20 = smov 1024   ;;  %260 = vmatprep.mubr.bf16.mxu0 %v3504_v8  ;;  %301 = vmatprep.mubr.bf16.mxu1 %v3504_v8  ;;  %vm416_vm3 = vcmask 1045504   ;;  %vm1391_vm6 = vcmask 64512   ;;  %s69_s19 = int_to_ptr.vmem [resolvable:$true] %s68_s19 }
  0x15   :  { %72 = sst [smem:[#allocation8]] %s3491_s20  ;;  %s3492_s21 = smov 8  }
  0x16   :  { %74 = sst [smem:[#allocation8 + $0x1]] %s3491_s20  ;;  %s3493_s23 = smov 64  }
  0x17   :  { %76 = sst [smem:[#allocation8 + $0x2]] %s3492_s21  ;;  %s3494_s25 = smov 128  }
  0x18   :  { %78 = sst [smem:[#allocation8 + $0x3]] %s3493_s23  ;;  %s3495_s3 = smov 2  }
  0x19   :  { %s3008_s24 = sshll.u32 %s60_s17, 26  ;;  %80 = sst [smem:[#allocation8 + $0x4]] %s3494_s25 }
  0x1a   :  { %s3582_s26 = sadd.s32 134217728, %s3008_s24  ;;  %82 = sst [smem:[#allocation8 + $0x5]] %s3495_s3 }
  0x1b   :  { %s3496_s22 = smov 512   ;;  %86 = sst [smem:[#allocation8 + $0x7]] %s3493_s23 }
  0x1c   :  { %84 = sst [smem:[#allocation8 + $0x6]] %s3496_s22  ;;  %s3497_s27 = smov 4  }
  0x1d   :  { %88 = sst [smem:[#allocation8 + $0x8]] %s3497_s27  ;;  %s3498_s28 = smov [#allocation4]  }
  0x1e   :  { %s3499_s29 = smov [#allocation7]   ;;  %s3500_s14 = smov [#allocation3]  }
  0x1f   :  { %90 = dma.general %s3907_s10, 16384, %s69_s19, %s3498_s28, %s3499_s29, [#allocation8], %s3582_s26, 0  }
  0x20   :  { %107 = sst [smem:[#allocation10]] %s3496_s22  ;;  %s103_s15 = sshll.u32 %s3500_s14, 4  ;;  %s104_s15 = int_to_ptr.vmem [resolvable:$true] %s103_s15 }
  0x21   :  { %109 = sst [smem:[#allocation10 + $0x1]] %s3496_s22  ;;  %s3501_s16 = smov 256  }
  0x22   :  { %111 = sst [smem:[#allocation10 + $0x2]] %s3497_s27  ;;  %s3502_s17 = smov [#allocation4 + $0x1]  }
  0x23   :  { %113 = sst [smem:[#allocation10 + $0x3]] %s3493_s23  ;;  %s3503_s18 = smov [#allocation9]  }
  0x24   :  { %115 = sst [smem:[#allocation10 + $0x4]] %s3494_s25 }
  0x25   :  { %117 = sst [smem:[#allocation10 + $0x5]] %s3495_s3 }
  0x26   :  { %119 = sst [smem:[#allocation10 + $0x6]] %s3501_s16 }
  0x27   :  { %121 = sst [smem:[#allocation10 + $0x7]] %s3493_s23 }
  0x28   :  { %123 = sst [smem:[#allocation10 + $0x8]] %s3497_s27 }
  0x29   :  { %125 = dma.general %s3908_s11, 8192, %s104_s15, %s3502_s17, %s3503_s18, [#allocation10], %s3582_s26, 0  }
  0x2a   :  { %v128_v0 = vld [vmem:[%s3898_s1] sm:$0xff]  ;;  %v129_v2 = vld [vmem:[%s3898_s1 + $0x8] sm:$0xff]  ;;  %v130_v15 = vld [vmem:[%s3898_s1 + $0x10] sm:$0xff] }
  0x2b   :  { %v132_v1 = vld [vmem:[%s3898_s1 + $0x20] sm:$0xff]  ;;  %v133_v4 = vld [vmem:[%s3898_s1 + $0x28] sm:$0xff]  ;;  %v134_v16 = vld [vmem:[%s3898_s1 + $0x30] sm:$0xff] }
  0x2c   :  { %v3013_v3 = vcombine.high %v128_v0, %v132_v1  ;;  %v3012_v5 = vcombine.low %v128_v0, %v132_v1  ;;  %v136_v6 = vld [vmem:[%s3898_s1 + $0x40] sm:$0xff]  ;;  %v3015_v9 = vcombine.high %v129_v2, %v133_v4  ;;  %v3014_v10 = vcombine.low %v129_v2, %v133_v4  ;;  %v137_v12 = vld [vmem:[%s3898_s1 + $0x48] sm:$0xff]  ;;  %v131_v17 = vld [vmem:[%s3898_s1 + $0x18] sm:$0xff] }
  0x2d   :  { %v140_v7 = vld [vmem:[%s3898_s1 + $0x60] sm:$0xff]  ;;  %v141_v13 = vld [vmem:[%s3898_s1 + $0x68] sm:$0xff]  ;;  %v135_v20 = vld [vmem:[%s3898_s1 + $0x38] sm:$0xff]  ;;  %v3017_v22 = vcombine.high %v130_v15, %v134_v16  ;;  %v3016_v29 = vcombine.low %v130_v15, %v134_v16 }
  0x2e   :  { %v3021_v11 = vcombine.high %v136_v6, %v140_v7  ;;  %228 = vmatprep.subr.bf16.mxu0 %v3013_v3  ;;  %v3023_v14 = vcombine.high %v137_v12, %v141_v13  ;;  %269 = vmatprep.subr.bf16.mxu1 %v3015_v9  ;;  %v3020_v18 = vcombine.low %v136_v6, %v140_v7  ;;  %v126_v19 = vld [vmem:[%s3897_s0] sm:$0x3]  ;;  %v138_v24 = vld [vmem:[%s3898_s1 + $0x50] sm:$0xff]  ;;  %v139_v27 = vld [vmem:[%s3898_s1 + $0x58] sm:$0xff] }
  0x2f   :  { %229 = vmatpush1.bf16.msra.mxu0 %v3012_v5  ;;  %270 = vmatpush1.bf16.msra.mxu1 %v3014_v10  ;;  %v3022_v21 = vcombine.low %v137_v12, %v141_v13  ;;  %v3019_v23 = vcombine.high %v131_v17, %v135_v20  ;;  %v142_v25 = vld [vmem:[%s3898_s1 + $0x70] sm:$0xff]  ;;  %v127_v26 = vpack.c.bf16 %v126_v19, %v126_v19  ;;  %v143_v28 = vld [vmem:[%s3898_s1 + $0x78] sm:$0xff]  ;;  %v439_v33 = vld [vmem:[#allocation5] sm:$0xff] }
  0x30   :  { %230 = vmatprep.subr.bf16.mxu0 %v3021_v11  ;;  %271 = vmatprep.subr.bf16.mxu1 %v3023_v14  ;;  %v3018_v30 = vcombine.low %v131_v17, %v135_v20  ;;  %v3025_v31 = vcombine.high %v138_v24, %v142_v25  ;;  %v3027_v32 = vcombine.high %v139_v27, %v143_v28  ;;  %v443_v34 = vld [vmem:[#allocation5 + $0x20] sm:$0xff]  ;;  %v440_v35 = vld [vmem:[#allocation5 + $0x8] sm:$0xff] }
  0x31   :  { %v444_v36 = vld [vmem:[#allocation5 + $0x28] sm:$0xff]  ;;  %v3024_v37 = vcombine.low %v138_v24, %v142_v25  ;;  %v3026_v38 = vcombine.low %v139_v27, %v143_v28  ;;  %v3033_v39 = vcombine.high %v439_v33, %v443_v34  ;;  %v447_v41 = vld [vmem:[#allocation5 + $0x40] sm:$0xff]  ;;  %v3032_v45 = vcombine.low %v439_v33, %v443_v34 }
  0x32   :  { %v3035_v40 = vcombine.high %v440_v35, %v444_v36  ;;  %v451_v42 = vld [vmem:[#allocation5 + $0x60] sm:$0xff]  ;;  %v448_v43 = vld [vmem:[#allocation5 + $0x48] sm:$0xff]  ;;  %v3034_v46 = vcombine.low %v440_v35, %v444_v36 }
  0x33   :  { %231 = vmatpush1.bf16.msra.mxu0 %v3020_v18  ;;  %272 = vmatpush1.bf16.msra.mxu1 %v3022_v21  ;;  %v452_v44 = vld [vmem:[#allocation5 + $0x68] sm:$0xff]  ;;  %v3041_v47 = vcombine.high %v447_v41, %v451_v42  ;;  %v455_v49 = vld [vmem:[#allocation5 + $0x80] sm:$0xff]  ;;  %v3040_v53 = vcombine.low %v447_v41, %v451_v42 }
  0x34   :  { %310 = vmatprep.subr.bf16.mxu0 %v3017_v22  ;;  %351 = vmatprep.subr.bf16.mxu1 %v3019_v23  ;;  %v3043_v48 = vcombine.high %v448_v43, %v452_v44  ;;  %v459_v50 = vld [vmem:[#allocation5 + $0xa0] sm:$0xff]  ;;  %v456_v51 = vld [vmem:[#allocation5 + $0x88] sm:$0xff]  ;;  %v3042_v56 = vcombine.low %v448_v43, %v452_v44 }
  0x35   :  { %v460_v52 = vld [vmem:[#allocation5 + $0xa8] sm:$0xff]  ;;  %v463_v54 = vld [vmem:[#allocation5 + $0xc0] sm:$0xff]  ;;  %v3049_v57 = vcombine.high %v455_v49, %v459_v50  ;;  %v3048_v61 = vcombine.low %v455_v49, %v459_v50 }
  0x36   :  { %3028 = vmatmul.mubr.msk.bf16.vlgmr.msra.gmra.mrb[0].mxu0 %vm224_vm0, %v127_v26  ;;  %3029 = vmatmul.mubr.msk.bf16.vlgmr.msra.gmra.mrb[0].mxu1 %vm224_vm0, %v127_v26  ;;  %v467_v55 = vld [vmem:[#allocation5 + $0xe0] sm:$0xff]  ;;  %v3051_v58 = vcombine.high %v456_v51, %v460_v52  ;;  %v464_v59 = vld [vmem:[#allocation5 + $0xc8] sm:$0xff]  ;;  %v3050_v62 = vcombine.low %v456_v51, %v460_v52 }
  0x37   :  { %311 = vmatpush1.bf16.msra.mxu0 %v3016_v29  ;;  %352 = vmatpush1.bf16.msra.mxu1 %v3018_v30  ;;  %v468_v60 = vld [vmem:[#allocation5 + $0xe8] sm:$0xff]  ;;  %v3057_v63 = vcombine.high %v463_v54, %v467_v55  ;;  %v471_v1 = vld [vmem:[#allocation5 + $0x100] sm:$0xff]  ;;  %v3056_v5 = vcombine.low %v463_v54, %v467_v55 }
  0x38   :  { %312 = vmatprep.subr.bf16.mxu0 %v3025_v31  ;;  %353 = vmatprep.subr.bf16.mxu1 %v3027_v32  ;;  %v3059_v0 = vcombine.high %v464_v59, %v468_v60  ;;  %v475_v2 = vld [vmem:[#allocation5 + $0x120] sm:$0xff]  ;;  %v472_v3 = vld [vmem:[#allocation5 + $0x108] sm:$0xff]  ;;  %v3058_v6 = vcombine.low %v464_v59, %v468_v60 }
  0x39   :  { %342 = vmatprep.mubr.bf16.mxu0 %v3504_v8  ;;  %383 = vmatprep.mubr.bf16.mxu1 %v3504_v8  ;;  %v476_v4 = vld [vmem:[#allocation5 + $0x128] sm:$0xff]  ;;  %v3065_v7 = vcombine.high %v471_v1, %v475_v2  ;;  %v479_v10 = vld [vmem:[#allocation5 + $0x140] sm:$0xff]  ;;  %v3064_v14 = vcombine.low %v471_v1, %v475_v2 }
  0x3a   :  { %v3067_v9 = vcombine.high %v472_v3, %v476_v4  ;;  %v483_v11 = vld [vmem:[#allocation5 + $0x160] sm:$0xff]  ;;  %v480_v12 = vld [vmem:[#allocation5 + $0x148] sm:$0xff]  ;;  %v3066_v15 = vcombine.low %v472_v3, %v476_v4 }
  0x3b   :  { %313 = vmatpush1.bf16.msra.mxu0 %v3024_v37  ;;  %354 = vmatpush1.bf16.msra.mxu1 %v3026_v38  ;;  %v484_v13 = vld [vmem:[#allocation5 + $0x168] sm:$0xff]  ;;  %v3073_v16 = vcombine.high %v479_v10, %v483_v11  ;;  %v487_v18 = vld [vmem:[#allocation5 + $0x180] sm:$0xff]  ;;  %v3072_v22 = vcombine.low %v479_v10, %v483_v11 }
  0x3c   :  { %1209 = vmatprep.subr.bf16.mxu0 %v3033_v39  ;;  %1250 = vmatprep.subr.bf16.mxu1 %v3035_v40  ;;  %v3075_v17 = vcombine.high %v480_v12, %v484_v13  ;;  %v491_v19 = vld [vmem:[#allocation5 + $0x1a0] sm:$0xff]  ;;  %v488_v20 = vld [vmem:[#allocation5 + $0x188] sm:$0xff]  ;;  %v3074_v23 = vcombine.low %v480_v12, %v484_v13 }
  0x3d   :  { %v492_v21 = vld [vmem:[#allocation5 + $0x1a8] sm:$0xff]  ;;  %v3081_v24 = vcombine.high %v487_v18, %v491_v19  ;;  %v499_v27 = vld [vmem:[#allocation5 + $0x1e0] sm:$0xff]  ;;  %v3080_v30 = vcombine.low %v487_v18, %v491_v19 }
  0x3e   :  { %3030 = vmatmul.mubr.msk.bf16.vlgmr.msra.gmra.mrb[4].mxu0 %vm224_vm0, %v127_v26  ;;  %3031 = vmatmul.mubr.msk.bf16.vlgmr.msra.gmra.mrb[4].mxu1 %vm224_vm0, %v127_v26  ;;  %v3083_v25 = vcombine.high %v488_v20, %v492_v21  ;;  %v495_v26 = vld [vmem:[#allocation5 + $0x1c0] sm:$0xff]  ;;  %v496_v28 = vld [vmem:[#allocation5 + $0x1c8] sm:$0xff]  ;;  %v3082_v31 = vcombine.low %v488_v20, %v492_v21 }
  0x3f   :  { %1210 = vmatpush1.bf16.msra.mxu0 %v3032_v45  ;;  %1251 = vmatpush1.bf16.msra.mxu1 %v3034_v46  ;;  %v500_v29 = vld [vmem:[#allocation5 + $0x1e8] sm:$0xff]  ;;  %v3089_v32 = vcombine.high %v495_v26, %v499_v27  ;;  %v503_v34 = vld [vmem:[#allocation5 + $0x200] sm:$0xff]  ;;  %v3088_v38 = vcombine.low %v495_v26, %v499_v27 }
  0x40   :  { %1211 = vmatprep.subr.bf16.mxu0 %v3041_v47  ;;  %1252 = vmatprep.subr.bf16.mxu1 %v3043_v48  ;;  %v3091_v33 = vcombine.high %v496_v28, %v500_v29  ;;  %v507_v35 = vld [vmem:[#allocation5 + $0x220] sm:$0xff]  ;;  %v504_v36 = vld [vmem:[#allocation5 + $0x208] sm:$0xff]  ;;  %v3090_v39 = vcombine.low %v496_v28, %v500_v29 }
  0x41   :  { %v508_v37 = vld [vmem:[#allocation5 + $0x228] sm:$0xff]  ;;  %v3097_v40 = vcombine.high %v503_v34, %v507_v35  ;;  %v511_v42 = vld [vmem:[#allocation5 + $0x240] sm:$0xff]  ;;  %v3096_v46 = vcombine.low %v503_v34, %v507_v35 }
  0x42   :  { %v3099_v41 = vcombine.high %v504_v36, %v508_v37  ;;  %v515_v43 = vld [vmem:[#allocation5 + $0x260] sm:$0xff]  ;;  %v512_v44 = vld [vmem:[#allocation5 + $0x248] sm:$0xff]  ;;  %v3098_v47 = vcombine.low %v504_v36, %v508_v37  ;;  %v3651_v37 = vld [vmem:[#allocation5 + $0x10] sm:$0xff] }
  0x43   :  { %1212 = vmatpush1.bf16.msra.mxu0 %v3040_v53  ;;  %1253 = vmatpush1.bf16.msra.mxu1 %v3042_v56  ;;  %v516_v45 = vld [vmem:[#allocation5 + $0x268] sm:$0xff]  ;;  %v3105_v48 = vcombine.high %v511_v42, %v515_v43  ;;  %v519_v50 = vld [vmem:[#allocation5 + $0x280] sm:$0xff]  ;;  %v3104_v54 = vcombine.low %v511_v42, %v515_v43 }
  0x44   :  { %1213 = vmatprep.subr.bf16.mxu0 %v3049_v57  ;;  %1254 = vmatprep.subr.bf16.mxu1 %v3051_v58  ;;  %v3107_v49 = vcombine.high %v512_v44, %v516_v45  ;;  %v523_v51 = vld [vmem:[#allocation5 + $0x2a0] sm:$0xff]  ;;  %v520_v52 = vld [vmem:[#allocation5 + $0x288] sm:$0xff]  ;;  %v3106_v55 = vcombine.low %v512_v44, %v516_v45  ;;  %v421_v45 = vlaneseq }
  0x45   :  { %v524_v53 = vld [vmem:[#allocation5 + $0x2a8] sm:$0xff]  ;;  %v3113_v56 = vcombine.high %v519_v50, %v523_v51  ;;  %v3112_v58 = vcombine.low %v519_v50, %v523_v51  ;;  %v527_v60 = vld [vmem:[#allocation5 + $0x2c0] sm:$0xff] }
  0x46   :  { %v3115_v57 = vcombine.high %v520_v52, %v524_v53  ;;  %v3114_v59 = vcombine.low %v520_v52, %v524_v53  ;;  %v535_v4 = vld [vmem:[#allocation5 + $0x300] sm:$0xff]  ;;  %v564_v34 = vld [vmem:[#allocation5 + $0x3e8] sm:$0xff] }
  0x47   :  { %1214 = vmatpush1.bf16.msra.mxu0 %v3048_v61  ;;  %1255 = vmatpush1.bf16.msra.mxu1 %v3050_v62  ;;  %v531_v61 = vld [vmem:[#allocation5 + $0x2e0] sm:$0xff]  ;;  %v528_v62 = vld [vmem:[#allocation5 + $0x2c8] sm:$0xff] }
  0x48   :  { %1215 = vmatprep.subr.bf16.mxu0 %v3057_v63  ;;  %1256 = vmatprep.subr.bf16.mxu1 %v3059_v0  ;;  %v3121_v63 = vcombine.high %v527_v60, %v531_v61  ;;  %v532_v0 = vld [vmem:[#allocation5 + $0x2e8] sm:$0xff]  ;;  %v3120_v1 = vcombine.low %v527_v60, %v531_v61  ;;  %v543_v13 = vld [vmem:[#allocation5 + $0x340] sm:$0xff] }
  0x49   :  { %v3122_v2 = vcombine.low %v528_v62, %v532_v0  ;;  %v3123_v3 = vcombine.high %v528_v62, %v532_v0  ;;  %v551_v21 = vld [vmem:[#allocation5 + $0x380] sm:$0xff] }
  0x4a   :  { %v559_v29 = vld [vmem:[#allocation5 + $0x3c0] sm:$0xff] }
  0x4b   :  { %1216 = vmatpush1.bf16.msra.mxu0 %v3056_v5  ;;  %1257 = vmatpush1.bf16.msra.mxu1 %v3058_v6  ;;  %v539_v5 = vld [vmem:[#allocation5 + $0x320] sm:$0xff]  ;;  %v536_v6 = vld [vmem:[#allocation5 + $0x308] sm:$0xff] }
  0x4c   :  { %1217 = vmatprep.subr.bf16.mxu0 %v3065_v7  ;;  %1258 = vmatprep.subr.bf16.mxu1 %v3067_v9  ;;  %v3129_v7 = vcombine.high %v535_v4, %v539_v5  ;;  %v540_v9 = vld [vmem:[#allocation5 + $0x328] sm:$0xff]  ;;  %v3128_v10 = vcombine.low %v535_v4, %v539_v5  ;;  %v419_v60 = vld [vmem:[%s3899_s2] sm:$0x3] }
  0x4d   :  { %v3130_v11 = vcombine.low %v536_v6, %v540_v9  ;;  %v3131_v12 = vcombine.high %v536_v6, %v540_v9 }
  0x4f   :  { %1218 = vmatpush1.bf16.msra.mxu0 %v3064_v14  ;;  %1259 = vmatpush1.bf16.msra.mxu1 %v3066_v15  ;;  %v547_v14 = vld [vmem:[#allocation5 + $0x360] sm:$0xff]  ;;  %v544_v15 = vld [vmem:[#allocation5 + $0x348] sm:$0xff] }
  0x50   :  { %1219 = vmatprep.subr.bf16.mxu0 %v3073_v16  ;;  %1260 = vmatprep.subr.bf16.mxu1 %v3075_v17  ;;  %v3137_v16 = vcombine.high %v543_v13, %v547_v14  ;;  %v548_v17 = vld [vmem:[#allocation5 + $0x368] sm:$0xff]  ;;  %v3136_v18 = vcombine.low %v543_v13, %v547_v14 }
  0x51   :  { %v3138_v19 = vcombine.low %v544_v15, %v548_v17  ;;  %v3139_v20 = vcombine.high %v544_v15, %v548_v17 }
  0x53   :  { %1220 = vmatpush1.bf16.msra.mxu0 %v3072_v22  ;;  %1261 = vmatpush1.bf16.msra.mxu1 %v3074_v23  ;;  %v555_v22 = vld [vmem:[#allocation5 + $0x3a0] sm:$0xff] }
  0x54   :  { %1221 = vmatprep.subr.bf16.mxu0 %v3081_v24  ;;  %1262 = vmatprep.subr.bf16.mxu1 %v3083_v25  ;;  %v3145_v23 = vcombine.high %v551_v21, %v555_v22  ;;  %v552_v24 = vld [vmem:[#allocation5 + $0x388] sm:$0xff]  ;;  %v3144_v26 = vcombine.low %v551_v21, %v555_v22  ;;  %v449_v22 = vld [vmem:[#allocation5 + $0x50] sm:$0xff] }
  0x55   :  { %v556_v25 = vld [vmem:[#allocation5 + $0x3a8] sm:$0xff] }
  0x56   :  { %v3146_v27 = vcombine.low %v552_v24, %v556_v25  ;;  %v3147_v28 = vcombine.high %v552_v24, %v556_v25  ;;  %v453_v24 = vld [vmem:[#allocation5 + $0x70] sm:$0xff]  ;;  %v450_v25 = vld [vmem:[#allocation5 + $0x58] sm:$0xff] }
  0x57   :  { %1222 = vmatpush1.bf16.msra.mxu0 %v3080_v30  ;;  %1263 = vmatpush1.bf16.msra.mxu1 %v3082_v31  ;;  %v563_v30 = vld [vmem:[#allocation5 + $0x3e0] sm:$0xff]  ;;  %v560_v31 = vld [vmem:[#allocation5 + $0x3c8] sm:$0xff] }
  0x58   :  { %1223 = vmatprep.subr.bf16.mxu0 %v3089_v32  ;;  %1264 = vmatprep.subr.bf16.mxu1 %v3091_v33  ;;  %v3152_v32 = vcombine.low %v559_v29, %v563_v30  ;;  %v3153_v33 = vcombine.high %v559_v29, %v563_v30  ;;  %v3154_v35 = vcombine.low %v560_v31, %v564_v34  ;;  %v457_v29 = vld [vmem:[#allocation5 + $0x90] sm:$0xff] }
  0x59   :  { %v3155_v36 = vcombine.high %v560_v31, %v564_v34  ;;  %v3045_v30 = vcombine.high %v449_v22, %v453_v24  ;;  %v462_v34 = vld [vmem:[#allocation5 + $0xb8] sm:$0xff] }
  0x5b   :  { %1224 = vmatpush1.bf16.msra.mxu0 %v3088_v38  ;;  %1265 = vmatpush1.bf16.msra.mxu1 %v3090_v39  ;;  %v3653_v38 = vld [vmem:[#allocation5 + $0x30] sm:$0xff]  ;;  %v3655_v39 = vld [vmem:[#allocation5 + $0x18] sm:$0xff] }
  0x5c   :  { %1225 = vmatprep.subr.bf16.mxu0 %v3097_v40  ;;  %1266 = vmatprep.subr.bf16.mxu1 %v3099_v41  ;;  %v3037_v40 = vcombine.high %v3651_v37, %v3653_v38  ;;  %v3659_v41 = vld [vmem:[#allocation5 + $0x38] sm:$0xff]  ;;  %v3036_v42 = vcombine.low %v3651_v37, %v3653_v38 }
  0x5d   :  { %v3038_v43 = vcombine.low %v3655_v39, %v3659_v41  ;;  %v3039_v44 = vcombine.high %v3655_v39, %v3659_v41 }
  0x5f   :  { %1226 = vmatpush1.bf16.msra.mxu0 %v3096_v46  ;;  %1267 = vmatpush1.bf16.msra.mxu1 %v3098_v47 }
  0x60   :  { %1227 = vmatprep.subr.bf16.mxu0 %v3105_v48  ;;  %1268 = vmatprep.subr.bf16.mxu1 %v3107_v49  ;;  %v422_v49 = vshrl.u32 %v421_v45, 7  ;;  %v465_v45 = vld [vmem:[#allocation5 + $0xd0] sm:$0xff] }
  0x62   :  { %v3672_v61 = vsub.s32 1, %v422_v49 }
  0x63   :  { %1228 = vmatpush1.bf16.msra.mxu0 %v3104_v54  ;;  %1269 = vmatpush1.bf16.msra.mxu1 %v3106_v55 }
  0x64   :  { %1229 = vmatprep.subr.bf16.mxu0 %v3113_v56  ;;  %1270 = vmatprep.subr.bf16.mxu1 %v3115_v57  ;;  %v428_v6 = vrot.slane %v419_v60, %v3672_v61 }
  0x67   :  { %1230 = vmatpush1.bf16.msra.mxu0 %v3112_v58  ;;  %1271 = vmatpush1.bf16.msra.mxu1 %v3114_v59  ;;  %v3667_v59 = vsub.s32 0, %v422_v49  ;;  %v474_v49 = vld [vmem:[#allocation5 + $0x118] sm:$0xff] }
  0x68   :  { %1231 = vmatprep.subr.bf16.mxu0 %v3121_v63  ;;  %1272 = vmatprep.subr.bf16.mxu1 %v3123_v3 }
  0x6b   :  { %1232 = vmatpush1.bf16.msra.mxu0 %v3120_v1  ;;  %1273 = vmatpush1.bf16.msra.mxu1 %v3122_v2  ;;  %v424_v1 = vrot.slane %v419_v60, %v3667_v59 }
  0x6c   :  { %1233 = vmatprep.subr.bf16.mxu0 %v3129_v7  ;;  %1274 = vmatprep.subr.bf16.mxu1 %v3131_v12 }
  0x6f   :  { %1234 = vmatpush1.bf16.msra.mxu0 %v3128_v10  ;;  %1275 = vmatpush1.bf16.msra.mxu1 %v3130_v11 }
  0x70   :  { %1235 = vmatprep.subr.bf16.mxu0 %v3137_v16  ;;  %1276 = vmatprep.subr.bf16.mxu1 %v3139_v20 }
  0x73   :  { %1236 = vmatpush1.bf16.msra.mxu0 %v3136_v18  ;;  %1277 = vmatpush1.bf16.msra.mxu1 %v3138_v19 }
  0x74   :  { %1237 = vmatprep.subr.bf16.mxu0 %v3145_v23  ;;  %1278 = vmatprep.subr.bf16.mxu1 %v3147_v28 }
  0x77   :  { %1238 = vmatpush1.bf16.msra.mxu0 %v3144_v26  ;;  %1279 = vmatpush1.bf16.msra.mxu1 %v3146_v27  ;;  %v454_v26 = vld [vmem:[#allocation5 + $0x78] sm:$0xff] }
  0x78   :  { %1239 = vmatprep.subr.bf16.mxu0 %v3153_v33  ;;  %1280 = vmatprep.subr.bf16.mxu1 %v3155_v36  ;;  %v3047_v31 = vcombine.high %v450_v25, %v454_v26  ;;  %v458_v33 = vld [vmem:[#allocation5 + $0x98] sm:$0xff]  ;;  %v3046_v36 = vcombine.low %v450_v25, %v454_v26  ;;  %v513_v26 = vld [vmem:[#allocation5 + $0x250] sm:$0xff] }
  0x79   :  { %v3054_v38 = vcombine.low %v458_v33, %v462_v34 }
  0x7b   :  { %1240 = vmatpush1.bf16.msra.mxu0 %v3152_v32  ;;  %1281 = vmatpush1.bf16.msra.mxu1 %v3154_v35  ;;  %v461_v32 = vld [vmem:[#allocation5 + $0xb0] sm:$0xff]  ;;  %v3044_v35 = vcombine.low %v449_v22, %v453_v24 }
  0x7c   :  { %1291 = vmatprep.subr.bf16.mxu0 %v3037_v40  ;;  %1332 = vmatprep.subr.bf16.mxu1 %v3039_v44  ;;  %v3053_v40 = vcombine.high %v457_v29, %v461_v32  ;;  %v3055_v44 = vcombine.high %v458_v33, %v462_v34  ;;  %v3052_v37 = vcombine.low %v457_v29, %v461_v32  ;;  %v514_v29 = vld [vmem:[#allocation5 + $0x258] sm:$0xff] }
 0x109   :  { %v262_v46 = vpop.f32.mrb[0].mxu0  ;;  %v303_v47 = vpop.f32.mrb[0].mxu1 }
 0x10a   :  { %v264_v48 = vpop.f32.mrb[1].mxu0  ;;  %v394_v50 = vrot.slane %v303_v47, 6  ;;  %v305_v51 = vpop.f32.mrb[1].mxu1  ;;  %v466_v47 = vld [vmem:[#allocation5 + $0xd8] sm:$0xff] }
 0x10b   :  { %v266_v52 = vpop.f32.mrb[2].mxu0  ;;  %v395_v53 = vrot.slane %v305_v51, 6  ;;  %v307_v54 = vpop.f32.mrb[2].mxu1 }
 0x10c   :  { %v267_v55 = vpop.f32.mrb[3].mxu0  ;;  %v411_v56 = vsel %vm410_vm1, %v262_v46, %v394_v50  ;;  %v308_v57 = vpop.f32.mrb[3].mxu1  ;;  %v469_v46 = vld [vmem:[#allocation5 + $0xf0] sm:$0xff]  ;;  %v478_v50 = vld [vmem:[#allocation5 + $0x138] sm:$0xff] }
 0x10d   :  { %v412_v58 = vsel %vm410_vm1, %v264_v48, %v395_v53  ;;  %v470_v48 = vld [vmem:[#allocation5 + $0xf8] sm:$0xff]  ;;  %v3061_v39 = vcombine.high %v465_v45, %v469_v46  ;;  %v3060_v51 = vcombine.low %v465_v45, %v469_v46  ;;  %v3071_v54 = vcombine.high %v474_v49, %v478_v50  ;;  %v481_v55 = vld [vmem:[#allocation5 + $0x150] sm:$0xff] }
 0x10e   :  { %v3063_v41 = vcombine.high %v466_v47, %v470_v48  ;;  %v3062_v52 = vcombine.low %v466_v47, %v470_v48  ;;  %v482_v57 = vld [vmem:[#allocation5 + $0x158] sm:$0xff] }
 0x111   :  { %v344_v62 = vpop.f32.mrb[4].mxu0  ;;  %v385_v0 = vpop.f32.mrb[4].mxu1 }
 0x112   :  { %v400_v63 = vrot.slane %v344_v62, 4  ;;  %v346_v2 = vpop.f32.mrb[5].mxu0  ;;  %v406_v3 = vrot.slane %v385_v0, 2  ;;  %v387_v5 = vpop.f32.mrb[5].mxu1  ;;  %v3070_v62 = vcombine.low %v474_v49, %v478_v50 }
 0x113   :  { %v401_v4 = vrot.slane %v346_v2, 4  ;;  %v348_v7 = vpop.f32.mrb[6].mxu0  ;;  %v407_v10 = vrot.slane %v387_v5, 2  ;;  %v389_v11 = vpop.f32.mrb[6].mxu1  ;;  %v493_v2 = vld [vmem:[#allocation5 + $0x1b0] sm:$0xff] }
 0x114   :  { %v414_v9 = vsel %vm413_vm2, %v411_v56, %v400_v63  ;;  %v349_v12 = vpop.f32.mrb[7].mxu0  ;;  %v390_v15 = vpop.f32.mrb[7].mxu1  ;;  %v485_v56 = vld [vmem:[#allocation5 + $0x170] sm:$0xff] }
 0x115   :  { %v417_v13 = vsel %vm416_vm3, %v414_v9, %v406_v3  ;;  %v415_v14 = vsel %vm413_vm2, %v412_v58, %v401_v4  ;;  %v486_v58 = vld [vmem:[#allocation5 + $0x178] sm:$0xff]  ;;  %v3077_v63 = vcombine.high %v481_v55, %v485_v56  ;;  %v3076_v5 = vcombine.low %v481_v55, %v485_v56  ;;  %v501_v11 = vld [vmem:[#allocation5 + $0x1f0] sm:$0xff] }
 0x116   :  { %v431_v16 = vadd.f32 %v424_v1, %v417_v13  ;;  %v418_v17 = vsel %vm416_vm3, %v415_v14, %v407_v10  ;;  %v3079_v0 = vcombine.high %v482_v57, %v486_v58  ;;  %v489_v1 = vld [vmem:[#allocation5 + $0x190] sm:$0xff]  ;;  %v490_v3 = vld [vmem:[#allocation5 + $0x198] sm:$0xff] }
 0x117   :  { %v432_v18 = vadd.f32 %v428_v6, %v418_v17  ;;  %v494_v4 = vld [vmem:[#allocation5 + $0x1b8] sm:$0xff]  ;;  %v3078_v6 = vcombine.low %v482_v57, %v486_v58  ;;  %v3085_v7 = vcombine.high %v489_v1, %v493_v2  ;;  %v497_v10 = vld [vmem:[#allocation5 + $0x1d0] sm:$0xff]  ;;  %v3084_v14 = vcombine.low %v489_v1, %v493_v2 }
 0x118   :  { %v435_v19 = vmul.f32 0.2, %v431_v16  ;;  %vm433_vm4 = vcmp.ge.f32.partialorder %v431_v16, 0.0  ;;  %v3087_v9 = vcombine.high %v490_v3, %v494_v4  ;;  %v498_v12 = vld [vmem:[#allocation5 + $0x1d8] sm:$0xff]  ;;  %v3086_v15 = vcombine.low %v490_v3, %v494_v4 }
 0x119   :  { %v436_v20 = vmul.f32 0.2, %v432_v18  ;;  %vm434_vm5 = vcmp.ge.f32.partialorder %v432_v18, 0.0  ;;  %v502_v13 = vld [vmem:[#allocation5 + $0x1f8] sm:$0xff]  ;;  %v3092_v22 = vcombine.low %v497_v10, %v501_v11 }
 0x11a   :  { %v437_v21 = vsel %vm433_vm4, %v431_v16, %v435_v19  ;;  %v3093_v16 = vcombine.high %v497_v10, %v501_v11  ;;  %v3095_v17 = vcombine.high %v498_v12, %v502_v13  ;;  %v509_v19 = vld [vmem:[#allocation5 + $0x230] sm:$0xff] }
 0x11b   :  { %v438_v23 = vsel %vm434_vm5, %v432_v18, %v436_v20  ;;  %v3680_v28 = vpack.c.bf16 %v437_v21, %v437_v21  ;;  %v505_v18 = vld [vmem:[#allocation5 + $0x210] sm:$0xff]  ;;  %v506_v20 = vld [vmem:[#allocation5 + $0x218] sm:$0xff] }
 0x11c   :  { %v568_v27 = vpack.c.bf16 %v438_v23, %v438_v23  ;;  %v510_v21 = vld [vmem:[#allocation5 + $0x238] sm:$0xff]  ;;  %v3094_v23 = vcombine.low %v498_v12, %v502_v13  ;;  %v3101_v24 = vcombine.high %v505_v18, %v509_v19 }
 0x11d   :  { %v3103_v25 = vcombine.high %v506_v20, %v510_v21  ;;  %v3102_v32 = vcombine.low %v506_v20, %v510_v21 }
 0x11e   :  { %1241 = vmatprep.mubr.bf16.mxu0 %v568_v27  ;;  %1282 = vmatprep.mubr.bf16.mxu1 %v568_v27 }
 0x11f   :  { %1242 = vmatmul.mubr.bf16.vlgmr.msra.gmra.mrb[8].mxu0 %v3680_v28  ;;  %1283 = vmatmul.mubr.bf16.vlgmr.msra.gmra.mrb[8].mxu1 %v3680_v28 }
 0x120   :  { %1292 = vmatpush1.bf16.msra.mxu0 %v3036_v42  ;;  %1333 = vmatpush1.bf16.msra.mxu1 %v3038_v43  ;;  %v473_v42 = vld [vmem:[#allocation5 + $0x110] sm:$0xff] }
 0x121   :  { %1323 = vmatprep.mubr.bf16.mxu0 %v568_v27  ;;  %1364 = vmatprep.mubr.bf16.mxu1 %v568_v27  ;;  %v477_v43 = vld [vmem:[#allocation5 + $0x130] sm:$0xff] }
 0x122   :  { %1293 = vmatprep.subr.bf16.mxu0 %v3045_v30  ;;  %1334 = vmatprep.subr.bf16.mxu1 %v3047_v31  ;;  %v3069_v53 = vcombine.high %v473_v42, %v477_v43  ;;  %v3068_v60 = vcombine.low %v473_v42, %v477_v43  ;;  %v517_v27 = vld [vmem:[#allocation5 + $0x270] sm:$0xff]  ;;  %v518_v30 = vld [vmem:[#allocation5 + $0x278] sm:$0xff]  ;;  %v3100_v31 = vcombine.low %v505_v18, %v509_v19 }
 0x123   :  { %v3109_v33 = vcombine.high %v513_v26, %v517_v27  ;;  %v3111_v34 = vcombine.high %v514_v29, %v518_v30  ;;  %v3108_v45 = vcombine.low %v513_v26, %v517_v27  ;;  %v3110_v46 = vcombine.low %v514_v29, %v518_v30 }
 0x124   :  { %1294 = vmatpush1.bf16.msra.mxu0 %v3044_v35  ;;  %1335 = vmatpush1.bf16.msra.mxu1 %v3046_v36  ;;  %v521_v35 = vld [vmem:[#allocation5 + $0x290] sm:$0xff] }
 0x125   :  { %1295 = vmatprep.subr.bf16.mxu0 %v3053_v40  ;;  %1336 = vmatprep.subr.bf16.mxu1 %v3055_v44  ;;  %v525_v36 = vld [vmem:[#allocation5 + $0x2b0] sm:$0xff]  ;;  %v522_v40 = vld [vmem:[#allocation5 + $0x298] sm:$0xff] }
 0x126   :  { %v526_v44 = vld [vmem:[#allocation5 + $0x2b8] sm:$0xff]  ;;  %v3117_v47 = vcombine.high %v521_v35, %v525_v36  ;;  %v3116_v42 = vcombine.low %v521_v35, %v525_v36 }
 0x127   :  { %v3119_v48 = vcombine.high %v522_v40, %v526_v44  ;;  %v3118_v43 = vcombine.low %v522_v40, %v526_v44 }
 0x128   :  { %1296 = vmatpush1.bf16.msra.mxu0 %v3052_v37  ;;  %1337 = vmatpush1.bf16.msra.mxu1 %v3054_v38  ;;  %v529_v37 = vld [vmem:[#allocation5 + $0x2d0] sm:$0xff] }
 0x129   :  { %1297 = vmatprep.subr.bf16.mxu0 %v3061_v39  ;;  %1338 = vmatprep.subr.bf16.mxu1 %v3063_v41  ;;  %v533_v38 = vld [vmem:[#allocation5 + $0x2f0] sm:$0xff]  ;;  %v530_v39 = vld [vmem:[#allocation5 + $0x2d8] sm:$0xff] }
 0x12a   :  { %v534_v41 = vld [vmem:[#allocation5 + $0x2f8] sm:$0xff]  ;;  %v3125_v49 = vcombine.high %v529_v37, %v533_v38  ;;  %v3124_v55 = vcombine.low %v529_v37, %v533_v38 }
 0x12b   :  { %v3127_v50 = vcombine.high %v530_v39, %v534_v41  ;;  %v3126_v56 = vcombine.low %v530_v39, %v534_v41 }
 0x12c   :  { %1298 = vmatpush1.bf16.msra.mxu0 %v3060_v51  ;;  %1339 = vmatpush1.bf16.msra.mxu1 %v3062_v52  ;;  %v537_v51 = vld [vmem:[#allocation5 + $0x310] sm:$0xff] }
 0x12d   :  { %1299 = vmatprep.subr.bf16.mxu0 %v3069_v53  ;;  %1340 = vmatprep.subr.bf16.mxu1 %v3071_v54  ;;  %v541_v52 = vld [vmem:[#allocation5 + $0x330] sm:$0xff]  ;;  %v538_v53 = vld [vmem:[#allocation5 + $0x318] sm:$0xff] }
 0x12e   :  { %v542_v54 = vld [vmem:[#allocation5 + $0x338] sm:$0xff]  ;;  %v3133_v57 = vcombine.high %v537_v51, %v541_v52  ;;  %v3132_v1 = vcombine.low %v537_v51, %v541_v52 }
 0x12f   :  { %v3135_v58 = vcombine.high %v538_v53, %v542_v54  ;;  %v3134_v2 = vcombine.low %v538_v53, %v542_v54  ;;  %v3417_v53 = vld [vmem:[%s3901_s4 + $0x10] sm:$0xff]  }
 0x130   :  { %1300 = vmatpush1.bf16.msra.mxu0 %v3068_v60  ;;  %1341 = vmatpush1.bf16.msra.mxu1 %v3070_v62  ;;  %v545_v60 = vld [vmem:[#allocation5 + $0x350] sm:$0xff] }
 0x131   :  { %1301 = vmatprep.subr.bf16.mxu0 %v3077_v63  ;;  %1342 = vmatprep.subr.bf16.mxu1 %v3079_v0  ;;  %v549_v62 = vld [vmem:[#allocation5 + $0x370] sm:$0xff]  ;;  %v546_v63 = vld [vmem:[#allocation5 + $0x358] sm:$0xff] }
 0x132   :  { %v550_v0 = vld [vmem:[#allocation5 + $0x378] sm:$0xff]  ;;  %v3141_v3 = vcombine.high %v545_v60, %v549_v62  ;;  %v3140_v10 = vcombine.low %v545_v60, %v549_v62 }
 0x133   :  { %v3143_v4 = vcombine.high %v546_v63, %v550_v0  ;;  %v3142_v11 = vcombine.low %v546_v63, %v550_v0 }
 0x134   :  { %1302 = vmatpush1.bf16.msra.mxu0 %v3076_v5  ;;  %1343 = vmatpush1.bf16.msra.mxu1 %v3078_v6  ;;  %v553_v5 = vld [vmem:[#allocation5 + $0x390] sm:$0xff] }
 0x135   :  { %1303 = vmatprep.subr.bf16.mxu0 %v3085_v7  ;;  %1344 = vmatprep.subr.bf16.mxu1 %v3087_v9  ;;  %v557_v6 = vld [vmem:[#allocation5 + $0x3b0] sm:$0xff]  ;;  %v554_v7 = vld [vmem:[#allocation5 + $0x398] sm:$0xff] }
 0x136   :  { %v558_v9 = vld [vmem:[#allocation5 + $0x3b8] sm:$0xff]  ;;  %v3149_v12 = vcombine.high %v553_v5, %v557_v6  ;;  %v3148_v18 = vcombine.low %v553_v5, %v557_v6 }
 0x137   :  { %v3151_v13 = vcombine.high %v554_v7, %v558_v9  ;;  %v3150_v19 = vcombine.low %v554_v7, %v558_v9 }
 0x138   :  { %1304 = vmatpush1.bf16.msra.mxu0 %v3084_v14  ;;  %1345 = vmatpush1.bf16.msra.mxu1 %v3086_v15  ;;  %v561_v14 = vld [vmem:[#allocation5 + $0x3d0] sm:$0xff] }
 0x139   :  { %1305 = vmatprep.subr.bf16.mxu0 %v3093_v16  ;;  %1346 = vmatprep.subr.bf16.mxu1 %v3095_v17  ;;  %v565_v15 = vld [vmem:[#allocation5 + $0x3f0] sm:$0xff]  ;;  %v562_v16 = vld [vmem:[#allocation5 + $0x3d8] sm:$0xff] }
 0x13a   :  { %v566_v17 = vld [vmem:[#allocation5 + $0x3f8] sm:$0xff]  ;;  %v3157_v20 = vcombine.high %v561_v14, %v565_v15 }
 0x13b   :  { %v3159_v21 = vcombine.high %v562_v16, %v566_v17 }
 0x13c   :  { %1306 = vmatpush1.bf16.msra.mxu0 %v3092_v22  ;;  %1347 = vmatpush1.bf16.msra.mxu1 %v3094_v23  ;;  %v3156_v22 = vcombine.low %v561_v14, %v565_v15  ;;  %v3158_v23 = vcombine.low %v562_v16, %v566_v17 }
 0x13d   :  { %1307 = vmatprep.subr.bf16.mxu0 %v3101_v24  ;;  %1348 = vmatprep.subr.bf16.mxu1 %v3103_v25 }
 0x140   :  { %1308 = vmatpush1.bf16.msra.mxu0 %v3100_v31  ;;  %1349 = vmatpush1.bf16.msra.mxu1 %v3102_v32 }
 0x141   :  { %1309 = vmatprep.subr.bf16.mxu0 %v3109_v33  ;;  %1350 = vmatprep.subr.bf16.mxu1 %v3111_v34 }
 0x144   :  { %1310 = vmatpush1.bf16.msra.mxu0 %v3108_v45  ;;  %1351 = vmatpush1.bf16.msra.mxu1 %v3110_v46  ;;  %v3416_v45 = vld [vmem:[%s3901_s4] sm:$0xff]  }
 0x145   :  { %1311 = vmatprep.subr.bf16.mxu0 %v3117_v47  ;;  %1352 = vmatprep.subr.bf16.mxu1 %v3119_v48 }
 0x148   :  { %1312 = vmatpush1.bf16.msra.mxu0 %v3116_v42  ;;  %1353 = vmatpush1.bf16.msra.mxu1 %v3118_v43 }
 0x149   :  { %1313 = vmatprep.subr.bf16.mxu0 %v3125_v49  ;;  %1354 = vmatprep.subr.bf16.mxu1 %v3127_v50 }
 0x14c   :  { %1314 = vmatpush1.bf16.msra.mxu0 %v3124_v55  ;;  %1355 = vmatpush1.bf16.msra.mxu1 %v3126_v56  ;;  %v3418_v55 = vld [vmem:[%s3901_s4 + $0x18] sm:$0xff]   ;;  %v1629_v56 = vld [vmem:[%s3902_s5] sm:$0x3] }
 0x14d   :  { %1315 = vmatprep.subr.bf16.mxu0 %v3133_v57  ;;  %1356 = vmatprep.subr.bf16.mxu1 %v3135_v58  ;;  %v1634_v57 = vrot.slane %v1629_v56, %v3667_v59  ;;  %v1638_v58 = vrot.slane %v1629_v56, %v3672_v61 }
 0x150   :  { %1316 = vmatpush1.bf16.msra.mxu0 %v3132_v1  ;;  %1357 = vmatpush1.bf16.msra.mxu1 %v3134_v2 }
 0x151   :  { %1317 = vmatprep.subr.bf16.mxu0 %v3141_v3  ;;  %1358 = vmatprep.subr.bf16.mxu1 %v3143_v4 }
 0x154   :  { %1318 = vmatpush1.bf16.msra.mxu0 %v3140_v10  ;;  %1359 = vmatpush1.bf16.msra.mxu1 %v3142_v11 }
 0x155   :  { %1319 = vmatprep.subr.bf16.mxu0 %v3149_v12  ;;  %1360 = vmatprep.subr.bf16.mxu1 %v3151_v13 }
 0x158   :  { %1320 = vmatpush1.bf16.msra.mxu0 %v3148_v18  ;;  %1361 = vmatpush1.bf16.msra.mxu1 %v3150_v19 }
 0x159   :  { %1321 = vmatprep.subr.bf16.mxu0 %v3157_v20  ;;  %1362 = vmatprep.subr.bf16.mxu1 %v3159_v21 }
 0x15c   :  { %1322 = vmatpush1.bf16.msra.mxu0 %v3156_v22  ;;  %1363 = vmatpush1.bf16.msra.mxu1 %v3158_v23 }
 0x15f   :  { %1324 = vmatmul.mubr.bf16.vlgmr.msra.gmra.mrb[12].mxu0 %v3680_v28  ;;  %1365 = vmatmul.mubr.bf16.vlgmr.msra.gmra.mrb[12].mxu1 %v3680_v28  ;;  %v3415_v28 = vld [vmem:[%s3901_s4 + $0x8] sm:$0xff]  }
 0x160   :  { %1433 = vmatprep.mubr.bf16.mxu0 %v3504_v8 }
 0x1f2   :  { %v1243_v24 = vpop.f32.mrb[8].mxu0  ;;  %v1284_v25 = vpop.f32.mrb[8].mxu1 }
 0x1f3   :  { %v1375_v26 = vpack.c.bf16 %v1284_v25, %v1284_v25  ;;  %v1245_v27 = vpop.f32.mrb[9].mxu0  ;;  %v1286_v29 = vpop.f32.mrb[9].mxu1  ;;  %v1373_v36 = vpack.c.bf16 %v1243_v24, %v1243_v24 }
 0x1f4   :  { %v1376_v30 = vpack.c.bf16 %v1286_v29, %v1286_v29  ;;  %v1247_v31 = vpop.f32.mrb[10].mxu0  ;;  %v1288_v32 = vpop.f32.mrb[10].mxu1  ;;  %v1374_v40 = vpack.c.bf16 %v1245_v27, %v1245_v27 }
 0x1f5   :  { %v1396_v33 = vsel %vm413_vm2, %v1375_v26, 0  ;;  %v1248_v34 = vpop.f32.mrb[11].mxu0  ;;  %v1289_v35 = vpop.f32.mrb[11].mxu1  ;;  %v1453_v44 = vsel %vm413_vm2, %v1373_v36, 0 }
 0x1f6   :  { %3163 = vmatprep.subr.msk.bf16.mxu0 %vm413_vm2, %v1376_v30 }
 0x1f7   :  { %1402 = vmatpush1.bf16.msra.mxu0 %v1396_v33 }
 0x1f8   :  { %3166 = vmatprep.subr.msk.bf16.mxu0 %vm413_vm2, %v1374_v40 }
 0x1fa   :  { %3164 = vmatmul.mubr.msk.bf16.vlgmr.msra.gmra.mrb[16].mxu0 %vm1391_vm6, %v3415_v28 }
 0x1fb   :  { %1459 = vmatpush1.bf16.msra.mxu0 %v1453_v44  ;;  %1490 = vmatprep.mubr.bf16.mxu0 %v3504_v8 }
 0x206   :  { %3167 = vmatmul.mubr.msk.bf16.vlgmr.msra.gmra.mrb[16].mxu0 %vm1391_vm6, %v3416_v45 }
 0x207   :  { %1550 = vmatprep.mubr.bf16.mxu0 %v3504_v8 }
 0x232   :  { %v1325_v46 = vpop.f32.mrb[12].mxu0  ;;  %v1366_v47 = vpop.f32.mrb[12].mxu1 }
 0x233   :  { %v1377_v48 = vpack.c.bf16 %v1325_v46, %v1325_v46  ;;  %v1327_v37 = vpop.f32.mrb[13].mxu0  ;;  %v1368_v38 = vpop.f32.mrb[13].mxu1  ;;  %v1379_v51 = vpack.c.bf16 %v1366_v47, %v1366_v47 }
 0x234   :  { %v1378_v39 = vpack.c.bf16 %v1327_v37, %v1327_v37  ;;  %v1329_v41 = vpop.f32.mrb[14].mxu0  ;;  %v1370_v42 = vpop.f32.mrb[14].mxu1  ;;  %v1380_v52 = vpack.c.bf16 %v1368_v38, %v1368_v38 }
 0x235   :  { %v1513_v43 = vsel %vm413_vm2, %v1377_v48, 0  ;;  %v1330_v49 = vpop.f32.mrb[15].mxu0  ;;  %v1371_v50 = vpop.f32.mrb[15].mxu1  ;;  %v1577_v54 = vsel %vm413_vm2, %v1379_v51, 0 }
 0x236   :  { %3171 = vmatprep.subr.msk.bf16.mxu0 %vm413_vm2, %v1378_v39 }
 0x237   :  { %1519 = vmatpush1.bf16.msra.mxu0 %v1513_v43 }
 0x238   :  { %3176 = vmatprep.subr.msk.bf16.mxu0 %vm413_vm2, %v1380_v52 }
 0x23a   :  { %3172 = vmatmul.mubr.msk.bf16.vlgmr.msra.gmra.mrb[16].mxu0 %vm1391_vm6, %v3417_v53 }
 0x23b   :  { %1583 = vmatpush1.bf16.msra.mxu0 %v1577_v54  ;;  %1614 = vmatprep.mubr.bf16.mxu0 %v3504_v8 }
 0x246   :  { %3177 = vmatmul.mubr.msk.bf16.vlgmr.msra.gmra.mrb[16].mxu0 %vm1391_vm6, %v3418_v55 }
 0x319   :  { %v1616_v60 = vpop.f32.mrb[16].mxu0 }
 0x31a   :  { %v1641_v62 = vadd.f32 %v1634_v57, %v1616_v60  ;;  %v1618_v63 = vpop.f32.mrb[17].mxu0 }
 0x31b   :  { %v1642_v0 = vadd.f32 %v1638_v58, %v1618_v63  ;;  %v1620_v1 = vpop.f32.mrb[18].mxu0 }
 0x31c   :  { %vm1645_vm7 = vcmp.ge.f32.partialorder %v1641_v62, 0.0  ;;  %v1649_v2 = vmul.f32 0.2, %v1641_v62  ;;  %v1643_v3 = vadd.f32 %v1634_v57, %v1620_v1  ;;  %v1622_v4 = vpop.f32.mrb[19].mxu0 }
 0x31d   :  { %vm1646_vm8 = vcmp.ge.f32.partialorder %v1642_v0, 0.0  ;;  %v1650_v5 = vmul.f32 0.2, %v1642_v0  ;;  %v1644_v6 = vadd.f32 %v1638_v58, %v1622_v4 }
 0x31e   :  { %v3725_v7 = vsel %vm1645_vm7, %v1641_v62, %v1649_v2  ;;  %vm1647_vm9 = vcmp.ge.f32.partialorder %v1643_v3, 0.0  ;;  %v1651_v9 = vmul.f32 0.2, %v1643_v3 }
 0x31f   :  { %v1654_v10 = vsel %vm1646_vm8, %v1642_v0, %v1650_v5  ;;  %vm1648_vm10 = vcmp.ge.f32.partialorder %v1644_v6, 0.0  ;;  %v1652_v11 = vmul.f32 0.2, %v1644_v6 }
 0x320   :  { %v3727_v12 = vsel %vm1647_vm9, %v1643_v3, %v1651_v9 }
 0x321   :  { %v1656_v13 = vsel %vm1648_vm10, %v1644_v6, %v1652_v11 }
 0x322   :  { %3483 = dma.done.wait [#allocation4], 16384 }
 0x323   :  { %3484 = vsyncadd [#allocation4], 4294950912  ;;  %v3729_v14 = vpack.c.bf16 %v1656_v13, %v1654_v10  ;;  %v1665_v15 = vld [vmem:[#allocation2 + $0x8] sm:$0xff]  ;;  %v1667_v16 = vld [vmem:[#allocation2 + $0x18] sm:$0xff]  ;;  %vm1993_vm11 = vcmask 130048  }
 0x324   :  { %v1664_v17 = vld [vmem:[#allocation2] sm:$0xff]  ;;  %1794 = vmatprep.subr.bf16.mxu1 %v1665_v15  ;;  %1837 = vmatprep.subr.bf16.mxu0 %v1667_v16  ;;  %v1666_v18 = vld [vmem:[#allocation2 + $0x10] sm:$0xff]  ;;  %v1673_v19 = vld [vmem:[#allocation2 + $0x48] sm:$0xff] }
 0x325   :  { %1826 = vmatprep.mubr.bf16.mxu1 %v3729_v14  ;;  %1869 = vmatprep.mubr.bf16.mxu0 %v3729_v14  ;;  %v1675_v20 = vld [vmem:[#allocation2 + $0x58] sm:$0xff]  ;;  %v1672_v21 = vld [vmem:[#allocation2 + $0x40] sm:$0xff]  ;;  %v1674_v22 = vld [vmem:[#allocation2 + $0x50] sm:$0xff] }
 0x326   :  { %1795 = vmatpush1.bf16.msra.mxu1 %v1664_v17  ;;  %1838 = vmatpush1.bf16.msra.mxu0 %v1666_v18  ;;  %v1681_v23 = vld [vmem:[#allocation2 + $0x88] sm:$0xff]  ;;  %v1683_v24 = vld [vmem:[#allocation2 + $0x98] sm:$0xff]  ;;  %v1680_v25 = vld [vmem:[#allocation2 + $0x80] sm:$0xff] }
 0x327   :  { %1796 = vmatprep.subr.bf16.mxu1 %v1673_v19  ;;  %1839 = vmatprep.subr.bf16.mxu0 %v1675_v20  ;;  %v1682_v26 = vld [vmem:[#allocation2 + $0x90] sm:$0xff]  ;;  %v1689_v27 = vld [vmem:[#allocation2 + $0xc8] sm:$0xff]  ;;  %v1691_v29 = vld [vmem:[#allocation2 + $0xd8] sm:$0xff] }
 0x328   :  { %v1688_v30 = vld [vmem:[#allocation2 + $0xc0] sm:$0xff]  ;;  %v1690_v31 = vld [vmem:[#allocation2 + $0xd0] sm:$0xff]  ;;  %v1697_v32 = vld [vmem:[#allocation2 + $0x108] sm:$0xff] }
 0x329   :  { %v1699_v33 = vld [vmem:[#allocation2 + $0x118] sm:$0xff]  ;;  %v1696_v34 = vld [vmem:[#allocation2 + $0x100] sm:$0xff]  ;;  %v1698_v35 = vld [vmem:[#allocation2 + $0x110] sm:$0xff] }
 0x32a   :  { %1797 = vmatpush1.bf16.msra.mxu1 %v1672_v21  ;;  %1840 = vmatpush1.bf16.msra.mxu0 %v1674_v22  ;;  %v1705_v36 = vld [vmem:[#allocation2 + $0x148] sm:$0xff]  ;;  %v1707_v40 = vld [vmem:[#allocation2 + $0x158] sm:$0xff]  ;;  %v1704_v28 = vld [vmem:[#allocation2 + $0x140] sm:$0xff] }
 0x32b   :  { %1798 = vmatprep.subr.bf16.mxu1 %v1681_v23  ;;  %1841 = vmatprep.subr.bf16.mxu0 %v1683_v24  ;;  %v1706_v44 = vld [vmem:[#allocation2 + $0x150] sm:$0xff]  ;;  %v1713_v45 = vld [vmem:[#allocation2 + $0x188] sm:$0xff]  ;;  %v1715_v46 = vld [vmem:[#allocation2 + $0x198] sm:$0xff]  ;;  %v3735_v23 = vpack.c.bf16 %v3727_v12, %v3725_v7 }
 0x32c   :  { %v1712_v47 = vld [vmem:[#allocation2 + $0x180] sm:$0xff]  ;;  %v1714_v48 = vld [vmem:[#allocation2 + $0x190] sm:$0xff]  ;;  %v1721_v37 = vld [vmem:[#allocation2 + $0x1c8] sm:$0xff] }
 0x32d   :  { %v1723_v38 = vld [vmem:[#allocation2 + $0x1d8] sm:$0xff]  ;;  %v1720_v39 = vld [vmem:[#allocation2 + $0x1c0] sm:$0xff]  ;;  %v1722_v41 = vld [vmem:[#allocation2 + $0x1d0] sm:$0xff] }
 0x32e   :  { %1799 = vmatpush1.bf16.msra.mxu1 %v1680_v25  ;;  %1842 = vmatpush1.bf16.msra.mxu0 %v1682_v26  ;;  %v1729_v42 = vld [vmem:[#allocation2 + $0x208] sm:$0xff]  ;;  %v1731_v43 = vld [vmem:[#allocation2 + $0x218] sm:$0xff]  ;;  %v1728_v49 = vld [vmem:[#allocation2 + $0x200] sm:$0xff] }
 0x32f   :  { %1800 = vmatprep.subr.bf16.mxu1 %v1689_v27  ;;  %1843 = vmatprep.subr.bf16.mxu0 %v1691_v29  ;;  %v1730_v50 = vld [vmem:[#allocation2 + $0x210] sm:$0xff]  ;;  %v1737_v51 = vld [vmem:[#allocation2 + $0x248] sm:$0xff]  ;;  %v1739_v52 = vld [vmem:[#allocation2 + $0x258] sm:$0xff] }
 0x330   :  { %v1736_v53 = vld [vmem:[#allocation2 + $0x240] sm:$0xff]  ;;  %v1738_v54 = vld [vmem:[#allocation2 + $0x250] sm:$0xff]  ;;  %v1745_v55 = vld [vmem:[#allocation2 + $0x288] sm:$0xff] }
 0x331   :  { %v1747_v56 = vld [vmem:[#allocation2 + $0x298] sm:$0xff]  ;;  %v1744_v57 = vld [vmem:[#allocation2 + $0x280] sm:$0xff]  ;;  %v1746_v58 = vld [vmem:[#allocation2 + $0x290] sm:$0xff] }
 0x332   :  { %1801 = vmatpush1.bf16.msra.mxu1 %v1688_v30  ;;  %1844 = vmatpush1.bf16.msra.mxu0 %v1690_v31  ;;  %v1753_v60 = vld [vmem:[#allocation2 + $0x2c8] sm:$0xff]  ;;  %v1755_v62 = vld [vmem:[#allocation2 + $0x2d8] sm:$0xff]  ;;  %v1752_v63 = vld [vmem:[#allocation2 + $0x2c0] sm:$0xff] }
 0x333   :  { %1802 = vmatprep.subr.bf16.mxu1 %v1697_v32  ;;  %1845 = vmatprep.subr.bf16.mxu0 %v1699_v33  ;;  %v1754_v0 = vld [vmem:[#allocation2 + $0x2d0] sm:$0xff]  ;;  %v1761_v1 = vld [vmem:[#allocation2 + $0x308] sm:$0xff]  ;;  %v1763_v2 = vld [vmem:[#allocation2 + $0x318] sm:$0xff] }
 0x334   :  { %v1760_v3 = vld [vmem:[#allocation2 + $0x300] sm:$0xff]  ;;  %v1762_v4 = vld [vmem:[#allocation2 + $0x310] sm:$0xff]  ;;  %v1769_v5 = vld [vmem:[#allocation2 + $0x348] sm:$0xff] }
 0x335   :  { %v1771_v6 = vld [vmem:[#allocation2 + $0x358] sm:$0xff]  ;;  %v1768_v9 = vld [vmem:[#allocation2 + $0x340] sm:$0xff]  ;;  %v1770_v10 = vld [vmem:[#allocation2 + $0x350] sm:$0xff] }
 0x336   :  { %1803 = vmatpush1.bf16.msra.mxu1 %v1696_v34  ;;  %1846 = vmatpush1.bf16.msra.mxu0 %v1698_v35  ;;  %v1777_v11 = vld [vmem:[#allocation2 + $0x388] sm:$0xff]  ;;  %v1779_v13 = vld [vmem:[#allocation2 + $0x398] sm:$0xff]  ;;  %v1776_v15 = vld [vmem:[#allocation2 + $0x380] sm:$0xff] }
 0x337   :  { %1804 = vmatprep.subr.bf16.mxu1 %v1705_v36  ;;  %1847 = vmatprep.subr.bf16.mxu0 %v1707_v40  ;;  %v1778_v16 = vld [vmem:[#allocation2 + $0x390] sm:$0xff]  ;;  %v1785_v17 = vld [vmem:[#allocation2 + $0x3c8] sm:$0xff]  ;;  %v1787_v18 = vld [vmem:[#allocation2 + $0x3d8] sm:$0xff] }
 0x338   :  { %v1784_v19 = vld [vmem:[#allocation2 + $0x3c0] sm:$0xff]  ;;  %v1786_v20 = vld [vmem:[#allocation2 + $0x3d0] sm:$0xff]  ;;  %v1669_v21 = vld [vmem:[#allocation2 + $0x28] sm:$0xff] }
 0x339   :  { %v1671_v22 = vld [vmem:[#allocation2 + $0x38] sm:$0xff]  ;;  %v1668_v24 = vld [vmem:[#allocation2 + $0x20] sm:$0xff]  ;;  %v1670_v25 = vld [vmem:[#allocation2 + $0x30] sm:$0xff] }
 0x33a   :  { %1805 = vmatpush1.bf16.msra.mxu1 %v1704_v28  ;;  %1848 = vmatpush1.bf16.msra.mxu0 %v1706_v44  ;;  %v1677_v26 = vld [vmem:[#allocation2 + $0x68] sm:$0xff]  ;;  %v1679_v27 = vld [vmem:[#allocation2 + $0x78] sm:$0xff]  ;;  %v1676_v29 = vld [vmem:[#allocation2 + $0x60] sm:$0xff] }
 0x33b   :  { %1806 = vmatprep.subr.bf16.mxu1 %v1713_v45  ;;  %1849 = vmatprep.subr.bf16.mxu0 %v1715_v46  ;;  %v1678_v30 = vld [vmem:[#allocation2 + $0x70] sm:$0xff]  ;;  %v1685_v7 = vld [vmem:[#allocation2 + $0xa8] sm:$0xff]  ;;  %v1687_v12 = vld [vmem:[#allocation2 + $0xb8] sm:$0xff] }
 0x33c   :  { %v1684_v31 = vld [vmem:[#allocation2 + $0xa0] sm:$0xff]  ;;  %v1686_v32 = vld [vmem:[#allocation2 + $0xb0] sm:$0xff]  ;;  %v1693_v33 = vld [vmem:[#allocation2 + $0xe8] sm:$0xff] }
 0x33d   :  { %v1695_v34 = vld [vmem:[#allocation2 + $0xf8] sm:$0xff]  ;;  %v1692_v35 = vld [vmem:[#allocation2 + $0xe0] sm:$0xff]  ;;  %v1694_v36 = vld [vmem:[#allocation2 + $0xf0] sm:$0xff] }
 0x33e   :  { %1807 = vmatpush1.bf16.msra.mxu1 %v1712_v47  ;;  %1850 = vmatpush1.bf16.msra.mxu0 %v1714_v48  ;;  %v1701_v40 = vld [vmem:[#allocation2 + $0x128] sm:$0xff]  ;;  %v1703_v28 = vld [vmem:[#allocation2 + $0x138] sm:$0xff]  ;;  %v1702_v44 = vld [vmem:[#allocation2 + $0x130] sm:$0xff] }
 0x33f   :  { %1808 = vmatprep.subr.bf16.mxu1 %v1721_v37  ;;  %1851 = vmatprep.subr.bf16.mxu0 %v1723_v38  ;;  %v1709_v45 = vld [vmem:[#allocation2 + $0x168] sm:$0xff]  ;;  %v1711_v46 = vld [vmem:[#allocation2 + $0x178] sm:$0xff]  ;;  %v1708_v47 = vld [vmem:[#allocation2 + $0x160] sm:$0xff] }
 0x340   :  { %v1710_v48 = vld [vmem:[#allocation2 + $0x170] sm:$0xff]  ;;  %v1717_v37 = vld [vmem:[#allocation2 + $0x1a8] sm:$0xff]  ;;  %v1719_v38 = vld [vmem:[#allocation2 + $0x1b8] sm:$0xff] }
 0x342   :  { %1809 = vmatpush1.bf16.msra.mxu1 %v1720_v39  ;;  %1852 = vmatpush1.bf16.msra.mxu0 %v1722_v41  ;;  %v1716_v39 = vld [vmem:[#allocation2 + $0x1a0] sm:$0xff]  ;;  %v1718_v41 = vld [vmem:[#allocation2 + $0x1b0] sm:$0xff] }
 0x343   :  { %1810 = vmatprep.subr.bf16.mxu1 %v1729_v42  ;;  %1853 = vmatprep.subr.bf16.mxu0 %v1731_v43  ;;  %v1725_v42 = vld [vmem:[#allocation2 + $0x1e8] sm:$0xff]  ;;  %v1727_v43 = vld [vmem:[#allocation2 + $0x1f8] sm:$0xff] }
 0x346   :  { %1811 = vmatpush1.bf16.msra.mxu1 %v1728_v49  ;;  %1854 = vmatpush1.bf16.msra.mxu0 %v1730_v50  ;;  %v1724_v49 = vld [vmem:[#allocation2 + $0x1e0] sm:$0xff]  ;;  %v1726_v50 = vld [vmem:[#allocation2 + $0x1f0] sm:$0xff] }
 0x347   :  { %1812 = vmatprep.subr.bf16.mxu1 %v1737_v51  ;;  %1855 = vmatprep.subr.bf16.mxu0 %v1739_v52  ;;  %v1733_v51 = vld [vmem:[#allocation2 + $0x228] sm:$0xff]  ;;  %v1735_v52 = vld [vmem:[#allocation2 + $0x238] sm:$0xff] }
 0x34a   :  { %1813 = vmatpush1.bf16.msra.mxu1 %v1736_v53  ;;  %1856 = vmatpush1.bf16.msra.mxu0 %v1738_v54  ;;  %v1732_v53 = vld [vmem:[#allocation2 + $0x220] sm:$0xff]  ;;  %v1734_v54 = vld [vmem:[#allocation2 + $0x230] sm:$0xff] }
 0x34b   :  { %1814 = vmatprep.subr.bf16.mxu1 %v1745_v55  ;;  %1857 = vmatprep.subr.bf16.mxu0 %v1747_v56  ;;  %v1741_v55 = vld [vmem:[#allocation2 + $0x268] sm:$0xff]  ;;  %v1743_v56 = vld [vmem:[#allocation2 + $0x278] sm:$0xff] }
 0x34e   :  { %1815 = vmatpush1.bf16.msra.mxu1 %v1744_v57  ;;  %1858 = vmatpush1.bf16.msra.mxu0 %v1746_v58  ;;  %v1740_v57 = vld [vmem:[#allocation2 + $0x260] sm:$0xff]  ;;  %v1742_v58 = vld [vmem:[#allocation2 + $0x270] sm:$0xff] }
 0x34f   :  { %1816 = vmatprep.subr.bf16.mxu1 %v1753_v60  ;;  %1859 = vmatprep.subr.bf16.mxu0 %v1755_v62  ;;  %v1749_v60 = vld [vmem:[#allocation2 + $0x2a8] sm:$0xff]  ;;  %v1751_v62 = vld [vmem:[#allocation2 + $0x2b8] sm:$0xff] }
 0x352   :  { %1817 = vmatpush1.bf16.msra.mxu1 %v1752_v63  ;;  %1860 = vmatpush1.bf16.msra.mxu0 %v1754_v0  ;;  %v1748_v63 = vld [vmem:[#allocation2 + $0x2a0] sm:$0xff]  ;;  %v1750_v0 = vld [vmem:[#allocation2 + $0x2b0] sm:$0xff] }
 0x353   :  { %1818 = vmatprep.subr.bf16.mxu1 %v1761_v1  ;;  %1861 = vmatprep.subr.bf16.mxu0 %v1763_v2  ;;  %v1757_v1 = vld [vmem:[#allocation2 + $0x2e8] sm:$0xff]  ;;  %v1759_v2 = vld [vmem:[#allocation2 + $0x2f8] sm:$0xff] }
 0x356   :  { %1819 = vmatpush1.bf16.msra.mxu1 %v1760_v3  ;;  %1862 = vmatpush1.bf16.msra.mxu0 %v1762_v4  ;;  %v1756_v3 = vld [vmem:[#allocation2 + $0x2e0] sm:$0xff]  ;;  %v1758_v4 = vld [vmem:[#allocation2 + $0x2f0] sm:$0xff] }
 0x357   :  { %1820 = vmatprep.subr.bf16.mxu1 %v1769_v5  ;;  %1863 = vmatprep.subr.bf16.mxu0 %v1771_v6  ;;  %v1765_v5 = vld [vmem:[#allocation2 + $0x328] sm:$0xff]  ;;  %v1767_v6 = vld [vmem:[#allocation2 + $0x338] sm:$0xff] }
 0x35a   :  { %1821 = vmatpush1.bf16.msra.mxu1 %v1768_v9  ;;  %1864 = vmatpush1.bf16.msra.mxu0 %v1770_v10  ;;  %v1764_v9 = vld [vmem:[#allocation2 + $0x320] sm:$0xff]  ;;  %v1766_v10 = vld [vmem:[#allocation2 + $0x330] sm:$0xff] }
 0x35b   :  { %1822 = vmatprep.subr.bf16.mxu1 %v1777_v11  ;;  %1865 = vmatprep.subr.bf16.mxu0 %v1779_v13  ;;  %v1773_v11 = vld [vmem:[#allocation2 + $0x368] sm:$0xff]  ;;  %v1775_v13 = vld [vmem:[#allocation2 + $0x378] sm:$0xff] }
 0x35e   :  { %1823 = vmatpush1.bf16.msra.mxu1 %v1776_v15  ;;  %1866 = vmatpush1.bf16.msra.mxu0 %v1778_v16  ;;  %v1772_v15 = vld [vmem:[#allocation2 + $0x360] sm:$0xff]  ;;  %v1774_v16 = vld [vmem:[#allocation2 + $0x370] sm:$0xff] }
 0x35f   :  { %1824 = vmatprep.subr.bf16.mxu1 %v1785_v17  ;;  %1867 = vmatprep.subr.bf16.mxu0 %v1787_v18  ;;  %v1781_v17 = vld [vmem:[#allocation2 + $0x3a8] sm:$0xff]  ;;  %v1783_v18 = vld [vmem:[#allocation2 + $0x3b8] sm:$0xff] }
 0x362   :  { %1825 = vmatpush1.bf16.msra.mxu1 %v1784_v19  ;;  %1868 = vmatpush1.bf16.msra.mxu0 %v1786_v20  ;;  %v1780_v19 = vld [vmem:[#allocation2 + $0x3a0] sm:$0xff]  ;;  %v1782_v20 = vld [vmem:[#allocation2 + $0x3b0] sm:$0xff] }
 0x363   :  { %1880 = vmatprep.subr.bf16.mxu1 %v1669_v21  ;;  %1923 = vmatprep.subr.bf16.mxu0 %v1671_v22  ;;  %v1789_v21 = vld [vmem:[#allocation2 + $0x3e8] sm:$0xff]  ;;  %v1791_v22 = vld [vmem:[#allocation2 + $0x3f8] sm:$0xff] }
 0x365   :  { %1827 = vmatmul.mubr.bf16.vlgmr.msra.gmra.mrb[16].mxu1 %v3735_v23  ;;  %1870 = vmatmul.mubr.bf16.vlgmr.msra.gmra.mrb[20].mxu0 %v3735_v23 }
 0x366   :  { %1881 = vmatpush1.bf16.msra.mxu1 %v1668_v24  ;;  %1924 = vmatpush1.bf16.msra.mxu0 %v1670_v25  ;;  %v1788_v24 = vld [vmem:[#allocation2 + $0x3e0] sm:$0xff]  ;;  %v1790_v25 = vld [vmem:[#allocation2 + $0x3f0] sm:$0xff] }
 0x367   :  { %1882 = vmatprep.subr.bf16.mxu1 %v1677_v26  ;;  %1925 = vmatprep.subr.bf16.mxu0 %v1679_v27 }
 0x368   :  { %1912 = vmatprep.mubr.bf16.mxu1 %v3729_v14  ;;  %1955 = vmatprep.mubr.bf16.mxu0 %v3729_v14  ;;  %v1700_v14 = vld [vmem:[#allocation2 + $0x120] sm:$0xff] }
 0x36a   :  { %1883 = vmatpush1.bf16.msra.mxu1 %v1676_v29  ;;  %1926 = vmatpush1.bf16.msra.mxu0 %v1678_v30 }
 0x36b   :  { %1884 = vmatprep.subr.bf16.mxu1 %v1685_v7  ;;  %1927 = vmatprep.subr.bf16.mxu0 %v1687_v12 }
 0x36e   :  { %1885 = vmatpush1.bf16.msra.mxu1 %v1684_v31  ;;  %1928 = vmatpush1.bf16.msra.mxu0 %v1686_v32 }
 0x36f   :  { %1886 = vmatprep.subr.bf16.mxu1 %v1693_v33  ;;  %1929 = vmatprep.subr.bf16.mxu0 %v1695_v34 }
 0x372   :  { %1887 = vmatpush1.bf16.msra.mxu1 %v1692_v35  ;;  %1930 = vmatpush1.bf16.msra.mxu0 %v1694_v36 }
 0x373   :  { %1888 = vmatprep.subr.bf16.mxu1 %v1701_v40  ;;  %1931 = vmatprep.subr.bf16.mxu0 %v1703_v28  ;;  %v3419_v40 = vld [vmem:[%s3903_s6 + $0x10] sm:$0xff]   ;;  %v3421_v28 = vld [vmem:[%s3903_s6] sm:$0xff]  }
 0x376   :  { %1889 = vmatpush1.bf16.msra.mxu1 %v1700_v14  ;;  %1932 = vmatpush1.bf16.msra.mxu0 %v1702_v44  ;;  %v3422_v14 = vld [vmem:[%s3903_s6 + $0x8] sm:$0xff]  }
 0x377   :  { %1890 = vmatprep.subr.bf16.mxu1 %v1709_v45  ;;  %1933 = vmatprep.subr.bf16.mxu0 %v1711_v46 }
 0x37a   :  { %1891 = vmatpush1.bf16.msra.mxu1 %v1708_v47  ;;  %1934 = vmatpush1.bf16.msra.mxu0 %v1710_v48 }
 0x37b   :  { %1892 = vmatprep.subr.bf16.mxu1 %v1717_v37  ;;  %1935 = vmatprep.subr.bf16.mxu0 %v1719_v38 }
 0x37e   :  { %1893 = vmatpush1.bf16.msra.mxu1 %v1716_v39  ;;  %1936 = vmatpush1.bf16.msra.mxu0 %v1718_v41 }
 0x37f   :  { %1894 = vmatprep.subr.bf16.mxu1 %v1725_v42  ;;  %1937 = vmatprep.subr.bf16.mxu0 %v1727_v43 }
 0x382   :  { %1895 = vmatpush1.bf16.msra.mxu1 %v1724_v49  ;;  %1938 = vmatpush1.bf16.msra.mxu0 %v1726_v50  ;;  %v3423_v50 = vld [vmem:[%s3903_s6 + $0x20] sm:$0xff]  }
 0x383   :  { %1896 = vmatprep.subr.bf16.mxu1 %v1733_v51  ;;  %1939 = vmatprep.subr.bf16.mxu0 %v1735_v52  ;;  %v3424_v51 = vld [vmem:[%s3903_s6 + $0x28] sm:$0xff]   ;;  %v3425_v52 = vld [vmem:[%s3903_s6 + $0x30] sm:$0xff]  }
 0x386   :  { %1897 = vmatpush1.bf16.msra.mxu1 %v1732_v53  ;;  %1940 = vmatpush1.bf16.msra.mxu0 %v1734_v54  ;;  %v3426_v53 = vld [vmem:[%s3903_s6 + $0x38] sm:$0xff]   ;;  %v2286_v54 = vld [vmem:[%s3904_s7] sm:$0x3] }
 0x387   :  { %1898 = vmatprep.subr.bf16.mxu1 %v1741_v55  ;;  %1941 = vmatprep.subr.bf16.mxu0 %v1743_v56  ;;  %v2291_v55 = vrot.slane %v2286_v54, %v3667_v59  ;;  %v2295_v56 = vrot.slane %v2286_v54, %v3672_v61 }
 0x38a   :  { %1899 = vmatpush1.bf16.msra.mxu1 %v1740_v57  ;;  %1942 = vmatpush1.bf16.msra.mxu0 %v1742_v58 }
 0x38b   :  { %1900 = vmatprep.subr.bf16.mxu1 %v1749_v60  ;;  %1943 = vmatprep.subr.bf16.mxu0 %v1751_v62 }
 0x38e   :  { %1901 = vmatpush1.bf16.msra.mxu1 %v1748_v63  ;;  %1944 = vmatpush1.bf16.msra.mxu0 %v1750_v0 }
 0x38f   :  { %1902 = vmatprep.subr.bf16.mxu1 %v1757_v1  ;;  %1945 = vmatprep.subr.bf16.mxu0 %v1759_v2 }
 0x392   :  { %1903 = vmatpush1.bf16.msra.mxu1 %v1756_v3  ;;  %1946 = vmatpush1.bf16.msra.mxu0 %v1758_v4 }
 0x393   :  { %1904 = vmatprep.subr.bf16.mxu1 %v1765_v5  ;;  %1947 = vmatprep.subr.bf16.mxu0 %v1767_v6 }
 0x396   :  { %1905 = vmatpush1.bf16.msra.mxu1 %v1764_v9  ;;  %1948 = vmatpush1.bf16.msra.mxu0 %v1766_v10 }
 0x397   :  { %1906 = vmatprep.subr.bf16.mxu1 %v1773_v11  ;;  %1949 = vmatprep.subr.bf16.mxu0 %v1775_v13 }
 0x39a   :  { %1907 = vmatpush1.bf16.msra.mxu1 %v1772_v15  ;;  %1950 = vmatpush1.bf16.msra.mxu0 %v1774_v16 }
 0x39b   :  { %1908 = vmatprep.subr.bf16.mxu1 %v1781_v17  ;;  %1951 = vmatprep.subr.bf16.mxu0 %v1783_v18 }
 0x39e   :  { %1909 = vmatpush1.bf16.msra.mxu1 %v1780_v19  ;;  %1952 = vmatpush1.bf16.msra.mxu0 %v1782_v20 }
 0x39f   :  { %1910 = vmatprep.subr.bf16.mxu1 %v1789_v21  ;;  %1953 = vmatprep.subr.bf16.mxu0 %v1791_v22 }
 0x3a2   :  { %1911 = vmatpush1.bf16.msra.mxu1 %v1788_v24  ;;  %1954 = vmatpush1.bf16.msra.mxu0 %v1790_v25 }
 0x3a5   :  { %1913 = vmatmul.mubr.bf16.vlgmr.msra.gmra.mrb[20].mxu1 %v3735_v23  ;;  %1956 = vmatmul.mubr.bf16.vlgmr.msra.gmra.mrb[24].mxu0 %v3735_v23  ;;  %v3420_v23 = vld [vmem:[%s3903_s6 + $0x18] sm:$0xff]  }
 0x3a6   :  { %2032 = vmatprep.mubr.bf16.mxu1 %v3504_v8 }
 0x438   :  { %v1828_v26 = vpop.f32.mrb[16].mxu1  ;;  %v1871_v27 = vpop.f32.mrb[20].mxu0 }
 0x439   :  { %v1830_v29 = vpop.f32.mrb[17].mxu1  ;;  %v1873_v30 = vpop.f32.mrb[21].mxu0 }
 0x43a   :  { %v1832_v7 = vpop.f32.mrb[18].mxu1  ;;  %v1875_v12 = vpop.f32.mrb[22].mxu0 }
 0x43b   :  { %v1966_v31 = vpack.c.bf16 %v1832_v7, %v1828_v26  ;;  %v1968_v32 = vpack.c.bf16 %v1875_v12, %v1871_v27  ;;  %v1834_v33 = vpop.f32.mrb[19].mxu1  ;;  %v1877_v34 = vpop.f32.mrb[23].mxu0 }
 0x43c   :  { %v1967_v35 = vpack.c.bf16 %v1834_v33, %v1830_v29  ;;  %v1969_v36 = vpack.c.bf16 %v1877_v34, %v1873_v30 }
 0x43e   :  { %2000 = vmatprep.subr.bf16.mxu1 %v1969_v36 }
 0x43f   :  { %2001 = vmatpush1.bf16.msra.mxu1 %v1968_v32 }
 0x440   :  { %2069 = vmatprep.subr.bf16.mxu1 %v1967_v35 }
 0x442   :  { %3184 = vmatmul.mubr.msk.bf16.vlgmr.msra.gmra.mrb[24].mxu1 %vm1993_vm11, %v3419_v40 }
 0x443   :  { %2070 = vmatpush1.bf16.msra.mxu1 %v1966_v31  ;;  %2042 = vmatprep.mubr.bf16.mxu1 %v3504_v8 }
 0x44a   :  { %3185 = vmatmul.mubr.msk.bf16.gmra.mrb[28].mxu1 %vm1993_vm11, %v3420_v23 }
 0x44b   :  { %2101 = vmatprep.mubr.bf16.mxu1 %v3504_v8 }
 0x452   :  { %3188 = vmatmul.mubr.msk.bf16.vlgmr.msra.gmra.mrb[24].mxu1 %vm1993_vm11, %v3421_v28 }
 0x453   :  { %2111 = vmatprep.mubr.bf16.mxu1 %v3504_v8 }
 0x45a   :  { %3189 = vmatmul.mubr.msk.bf16.gmra.mrb[28].mxu1 %vm1993_vm11, %v3422_v14 }
 0x45b   :  { %2175 = vmatprep.mubr.bf16.mxu1 %v3504_v8 }
 0x478   :  { %v1914_v44 = vpop.f32.mrb[20].mxu1  ;;  %v1957_v45 = vpop.f32.mrb[24].mxu0 }
 0x479   :  { %v1916_v46 = vpop.f32.mrb[21].mxu1  ;;  %v1959_v47 = vpop.f32.mrb[25].mxu0 }
 0x47a   :  { %v1918_v48 = vpop.f32.mrb[22].mxu1  ;;  %v1961_v37 = vpop.f32.mrb[26].mxu0 }
 0x47b   :  { %v1970_v38 = vpack.c.bf16 %v1918_v48, %v1914_v44  ;;  %v1920_v39 = vpop.f32.mrb[23].mxu1  ;;  %v1972_v41 = vpack.c.bf16 %v1961_v37, %v1957_v45  ;;  %v1963_v42 = vpop.f32.mrb[27].mxu0 }
 0x47c   :  { %v1971_v43 = vpack.c.bf16 %v1920_v39, %v1916_v46  ;;  %v1973_v49 = vpack.c.bf16 %v1963_v42, %v1959_v47 }
 0x47e   :  { %2143 = vmatprep.subr.bf16.mxu1 %v1971_v43 }
 0x47f   :  { %2144 = vmatpush1.bf16.msra.mxu1 %v1970_v38 }
 0x480   :  { %2225 = vmatprep.subr.bf16.mxu1 %v1973_v49 }
 0x482   :  { %3196 = vmatmul.mubr.msk.bf16.vlgmr.msra.gmra.mrb[24].mxu1 %vm1993_vm11, %v3423_v50 }
 0x483   :  { %2185 = vmatprep.mubr.bf16.mxu1 %v3504_v8  ;;  %2226 = vmatpush1.bf16.msra.mxu1 %v1972_v41 }
 0x48a   :  { %3197 = vmatmul.mubr.msk.bf16.gmra.mrb[28].mxu1 %vm1993_vm11, %v3424_v51 }
 0x48b   :  { %2257 = vmatprep.mubr.bf16.mxu1 %v3504_v8 }
 0x492   :  { %3204 = vmatmul.mubr.msk.bf16.vlgmr.msra.gmra.mrb[24].mxu1 %vm1993_vm11, %v3425_v52 }
 0x493   :  { %2267 = vmatprep.mubr.bf16.mxu1 %v3504_v8 }
 0x49a   :  { %3205 = vmatmul.mubr.msk.bf16.gmra.mrb[28].mxu1 %vm1993_vm11, %v3426_v53 }
 0x565   :  { %v2259_v57 = vpop.f32.mrb[24].mxu1 }
 0x566   :  { %v2298_v58 = vadd.f32 %v2291_v55, %v2259_v57  ;;  %v2261_v60 = vpop.f32.mrb[25].mxu1 }
 0x567   :  { %v2299_v62 = vadd.f32 %v2295_v56, %v2261_v60  ;;  %v2263_v63 = vpop.f32.mrb[26].mxu1 }
 0x568   :  { %vm2306_vm12 = vcmp.ge.f32.partialorder %v2298_v58, 0.0  ;;  %v2314_v8 = vmul.f32 0.2, %v2298_v58  ;;  %v2300_v0 = vadd.f32 %v2291_v55, %v2263_v63  ;;  %v2265_v1 = vpop.f32.mrb[27].mxu1 }
 0x569   :  { %vm2307_vm13 = vcmp.ge.f32.partialorder %v2299_v62, 0.0  ;;  %v2315_v2 = vmul.f32 0.2, %v2299_v62  ;;  %v2301_v3 = vadd.f32 %v2295_v56, %v2265_v1 }
 0x56a   :  { %v3788_v4 = vsel %vm2306_vm12, %v2298_v58, %v2314_v8  ;;  %vm2308_vm14 = vcmp.ge.f32.partialorder %v2300_v0, 0.0  ;;  %v2316_v5 = vmul.f32 0.2, %v2300_v0 }
 0x56b   :  { %v2323_v6 = vsel %vm2307_vm13, %v2299_v62, %v2315_v2  ;;  %vm2309_vm15 = vcmp.ge.f32.partialorder %v2301_v3, 0.0  ;;  %v2317_v59 = vmul.f32 0.2, %v2301_v3 }
 0x56c   :  { %v3790_v61 = vsel %vm2308_vm14, %v2300_v0, %v2316_v5 }
 0x56d   :  { %v2325_v9 = vsel %vm2309_vm15, %v2301_v3, %v2317_v59  ;;  %v2269_v10 = vpop.f32.mrb[28].mxu1 }
 0x56e   :  { %v2302_v11 = vadd.f32 %v2291_v55, %v2269_v10  ;;  %v2271_v13 = vpop.f32.mrb[29].mxu1 }
 0x56f   :  { %v2303_v15 = vadd.f32 %v2295_v56, %v2271_v13  ;;  %v2273_v16 = vpop.f32.mrb[30].mxu1 }
 0x570   :  { %vm2310_vm1 = vcmp.ge.f32.partialorder %v2302_v11, 0.0  ;;  %v2318_v17 = vmul.f32 0.2, %v2302_v11  ;;  %v2304_v18 = vadd.f32 %v2291_v55, %v2273_v16  ;;  %v2275_v19 = vpop.f32.mrb[31].mxu1 }
 0x571   :  { %vm2311_vm2 = vcmp.ge.f32.partialorder %v2303_v15, 0.0  ;;  %v2319_v20 = vmul.f32 0.2, %v2303_v15  ;;  %v2305_v21 = vadd.f32 %v2295_v56, %v2275_v19 }
 0x572   :  { %v3792_v22 = vsel %vm2310_vm1, %v2302_v11, %v2318_v17  ;;  %vm2312_vm3 = vcmp.ge.f32.partialorder %v2304_v18, 0.0  ;;  %v2320_v24 = vmul.f32 0.2, %v2304_v18 }
 0x573   :  { %v3794_v25 = vsel %vm2311_vm2, %v2303_v15, %v2319_v20  ;;  %vm2313_vm4 = vcmp.ge.f32.partialorder %v2305_v21, 0.0  ;;  %v2321_v26 = vmul.f32 0.2, %v2305_v21 }
 0x574   :  { %v3796_v27 = vsel %vm2312_vm3, %v2304_v18, %v2320_v24 }
 0x575   :  { %v3798_v29 = vsel %vm2313_vm4, %v2305_v21, %v2321_v26 }
 0x576   :  { %3485 = dma.done.wait [#allocation4 + $0x1], 8192 }
 0x577   :  { %3486 = vsyncadd [#allocation4 + $0x1], 4294959104  ;;  %v2403_v30 = vpack.c.bf16 %v2325_v9, %v2323_v6  ;;  %v2339_v7 = vld [vmem:[#allocation3 + $0x8] sm:$0xff]  ;;  %v2338_v12 = vld [vmem:[#allocation3] sm:$0xff] }
 0x578   :  { %v2343_v31 = vld [vmem:[#allocation3 + $0x28] sm:$0xff]  ;;  %2406 = vmatprep.subr.bf16.mxu0 %v2339_v7  ;;  %v2341_v32 = vld [vmem:[#allocation3 + $0x18] sm:$0xff]  ;;  %v2340_v33 = vld [vmem:[#allocation3 + $0x10] sm:$0xff] }
 0x579   :  { %2438 = vmatprep.mubr.bf16.mxu0 %v2403_v30  ;;  %2491 = vmatprep.mubr.bf16.mxu1 %v2403_v30  ;;  %v2342_v34 = vld [vmem:[#allocation3 + $0x20] sm:$0xff]  ;;  %v2345_v35 = vld [vmem:[#allocation3 + $0x38] sm:$0xff]  ;;  %v2347_v36 = vld [vmem:[#allocation3 + $0x48] sm:$0xff] }
 0x57a   :  { %2407 = vmatpush1.bf16.msra.mxu0 %v2338_v12  ;;  %2459 = vmatprep.subr.bf16.mxu1 %v2341_v32  ;;  %v2344_v40 = vld [vmem:[#allocation3 + $0x30] sm:$0xff]  ;;  %v2349_v23 = vld [vmem:[#allocation3 + $0x58] sm:$0xff]  ;;  %v2346_v28 = vld [vmem:[#allocation3 + $0x40] sm:$0xff] }
 0x57b   :  { %2408 = vmatprep.subr.bf16.mxu0 %v2343_v31  ;;  %2460 = vmatpush1.bf16.msra.mxu1 %v2340_v33  ;;  %v2351_v14 = vld [vmem:[#allocation3 + $0x68] sm:$0xff]  ;;  %v2348_v44 = vld [vmem:[#allocation3 + $0x50] sm:$0xff]  ;;  %v2353_v45 = vld [vmem:[#allocation3 + $0x78] sm:$0xff] }
 0x57c   :  { %2461 = vmatprep.subr.bf16.mxu1 %v2345_v35  ;;  %v2350_v46 = vld [vmem:[#allocation3 + $0x60] sm:$0xff]  ;;  %v2355_v47 = vld [vmem:[#allocation3 + $0x88] sm:$0xff]  ;;  %v2352_v48 = vld [vmem:[#allocation3 + $0x70] sm:$0xff]  ;;  %v2402_v35 = vpack.c.bf16 %v3790_v61, %v3788_v4 }
 0x57d   :  { %v2357_v37 = vld [vmem:[#allocation3 + $0x98] sm:$0xff]  ;;  %v2354_v38 = vld [vmem:[#allocation3 + $0x80] sm:$0xff]  ;;  %v2359_v39 = vld [vmem:[#allocation3 + $0xa8] sm:$0xff] }
 0x57e   :  { %2409 = vmatpush1.bf16.msra.mxu0 %v2342_v34  ;;  %v2356_v41 = vld [vmem:[#allocation3 + $0x90] sm:$0xff]  ;;  %v2361_v42 = vld [vmem:[#allocation3 + $0xb8] sm:$0xff]  ;;  %v2358_v43 = vld [vmem:[#allocation3 + $0xa0] sm:$0xff] }
 0x57f   :  { %2410 = vmatprep.subr.bf16.mxu0 %v2347_v36  ;;  %2462 = vmatpush1.bf16.msra.mxu1 %v2344_v40  ;;  %v2363_v49 = vld [vmem:[#allocation3 + $0xc8] sm:$0xff]  ;;  %v2360_v50 = vld [vmem:[#allocation3 + $0xb0] sm:$0xff]  ;;  %v2362_v51 = vld [vmem:[#allocation3 + $0xc0] sm:$0xff]  ;;  %v2405_v36 = vpack.c.bf16 %v3798_v29, %v3794_v25  ;;  %v2404_v40 = vpack.c.bf16 %v3796_v27, %v3792_v22 }
 0x580   :  { %2463 = vmatprep.subr.bf16.mxu1 %v2349_v23  ;;  %v2365_v52 = vld [vmem:[#allocation3 + $0xd8] sm:$0xff]  ;;  %v2367_v53 = vld [vmem:[#allocation3 + $0xe8] sm:$0xff]  ;;  %v2364_v54 = vld [vmem:[#allocation3 + $0xd0] sm:$0xff] }
 0x581   :  { %v2369_v55 = vld [vmem:[#allocation3 + $0xf8] sm:$0xff]  ;;  %v2366_v56 = vld [vmem:[#allocation3 + $0xe0] sm:$0xff]  ;;  %v2371_v57 = vld [vmem:[#allocation3 + $0x108] sm:$0xff] }
 0x582   :  { %2411 = vmatpush1.bf16.msra.mxu0 %v2346_v28  ;;  %v2368_v58 = vld [vmem:[#allocation3 + $0xf0] sm:$0xff]  ;;  %v2373_v60 = vld [vmem:[#allocation3 + $0x118] sm:$0xff]  ;;  %v2370_v62 = vld [vmem:[#allocation3 + $0x100] sm:$0xff] }
 0x583   :  { %2412 = vmatprep.subr.bf16.mxu0 %v2351_v14  ;;  %2464 = vmatpush1.bf16.msra.mxu1 %v2348_v44  ;;  %v2375_v63 = vld [vmem:[#allocation3 + $0x128] sm:$0xff]  ;;  %v2372_v8 = vld [vmem:[#allocation3 + $0x110] sm:$0xff]  ;;  %v2377_v0 = vld [vmem:[#allocation3 + $0x138] sm:$0xff] }
 0x584   :  { %2465 = vmatprep.subr.bf16.mxu1 %v2353_v45  ;;  %v2374_v1 = vld [vmem:[#allocation3 + $0x120] sm:$0xff]  ;;  %v2379_v2 = vld [vmem:[#allocation3 + $0x148] sm:$0xff]  ;;  %v2376_v3 = vld [vmem:[#allocation3 + $0x130] sm:$0xff] }
 0x585   :  { %v2381_v5 = vld [vmem:[#allocation3 + $0x158] sm:$0xff]  ;;  %v2378_v6 = vld [vmem:[#allocation3 + $0x140] sm:$0xff]  ;;  %v2383_v59 = vld [vmem:[#allocation3 + $0x168] sm:$0xff] }
 0x586   :  { %2413 = vmatpush1.bf16.msra.mxu0 %v2350_v46  ;;  %v2380_v9 = vld [vmem:[#allocation3 + $0x150] sm:$0xff]  ;;  %v2385_v10 = vld [vmem:[#allocation3 + $0x178] sm:$0xff]  ;;  %v2382_v11 = vld [vmem:[#allocation3 + $0x160] sm:$0xff] }
 0x587   :  { %2414 = vmatprep.subr.bf16.mxu0 %v2355_v47  ;;  %2466 = vmatpush1.bf16.msra.mxu1 %v2352_v48  ;;  %v2387_v13 = vld [vmem:[#allocation3 + $0x188] sm:$0xff]  ;;  %v2384_v15 = vld [vmem:[#allocation3 + $0x170] sm:$0xff]  ;;  %v2389_v16 = vld [vmem:[#allocation3 + $0x198] sm:$0xff] }
 0x588   :  { %2467 = vmatprep.subr.bf16.mxu1 %v2357_v37  ;;  %v2386_v17 = vld [vmem:[#allocation3 + $0x180] sm:$0xff]  ;;  %v2391_v18 = vld [vmem:[#allocation3 + $0x1a8] sm:$0xff]  ;;  %v2388_v19 = vld [vmem:[#allocation3 + $0x190] sm:$0xff] }
 0x589   :  { %v2393_v20 = vld [vmem:[#allocation3 + $0x1b8] sm:$0xff]  ;;  %v2390_v21 = vld [vmem:[#allocation3 + $0x1a0] sm:$0xff]  ;;  %v2395_v24 = vld [vmem:[#allocation3 + $0x1c8] sm:$0xff] }
 0x58a   :  { %2415 = vmatpush1.bf16.msra.mxu0 %v2354_v38  ;;  %v2392_v26 = vld [vmem:[#allocation3 + $0x1b0] sm:$0xff]  ;;  %v2397_v30 = vld [vmem:[#allocation3 + $0x1d8] sm:$0xff]  ;;  %v2394_v7 = vld [vmem:[#allocation3 + $0x1c0] sm:$0xff] }
 0x58b   :  { %2416 = vmatprep.subr.bf16.mxu0 %v2359_v39  ;;  %2468 = vmatpush1.bf16.msra.mxu1 %v2356_v41  ;;  %v2399_v12 = vld [vmem:[#allocation3 + $0x1e8] sm:$0xff]  ;;  %v2396_v31 = vld [vmem:[#allocation3 + $0x1d0] sm:$0xff]  ;;  %v2401_v32 = vld [vmem:[#allocation3 + $0x1f8] sm:$0xff] }
 0x58c   :  { %2469 = vmatprep.subr.bf16.mxu1 %v2361_v42  ;;  %v2398_v33 = vld [vmem:[#allocation3 + $0x1e0] sm:$0xff]  ;;  %v2400_v34 = vld [vmem:[#allocation3 + $0x1f0] sm:$0xff] }
 0x58d   :  { %v3427_v23 = vld [vmem:[%s3905_s8] sm:$0xff]  }
 0x58e   :  { %2417 = vmatpush1.bf16.msra.mxu0 %v2358_v43  ;;  %v3435_v4 = vld [vmem:[%s3905_s8 + $0x20] sm:$0xff]  }
 0x58f   :  { %2418 = vmatprep.subr.bf16.mxu0 %v2363_v49  ;;  %2470 = vmatpush1.bf16.msra.mxu1 %v2360_v50 }
 0x590   :  { %2471 = vmatprep.subr.bf16.mxu1 %v2365_v52 }
 0x592   :  { %2419 = vmatpush1.bf16.msra.mxu0 %v2362_v51 }
 0x593   :  { %2420 = vmatprep.subr.bf16.mxu0 %v2367_v53  ;;  %2472 = vmatpush1.bf16.msra.mxu1 %v2364_v54  ;;  %v3428_v54 = vld [vmem:[%s3905_s8 + $0x8] sm:$0xff]  }
 0x594   :  { %2473 = vmatprep.subr.bf16.mxu1 %v2369_v55 }
 0x596   :  { %2421 = vmatpush1.bf16.msra.mxu0 %v2366_v56  ;;  %v3429_v56 = vld [vmem:[%s3905_s8 + $0x10] sm:$0xff]  }
 0x597   :  { %2422 = vmatprep.subr.bf16.mxu0 %v2371_v57  ;;  %2474 = vmatpush1.bf16.msra.mxu1 %v2368_v58  ;;  %v3437_v57 = vld [vmem:[%s3905_s8 + $0x28] sm:$0xff]   ;;  %v3439_v58 = vld [vmem:[%s3905_s8 + $0x30] sm:$0xff]  }
 0x598   :  { %2475 = vmatprep.subr.bf16.mxu1 %v2373_v60  ;;  %v3430_v60 = vld [vmem:[%s3905_s8 + $0x18] sm:$0xff]  }
 0x59a   :  { %2423 = vmatpush1.bf16.msra.mxu0 %v2370_v62  ;;  %v3431_v62 = vld [vmem:[%s3905_s8 + $0x40] sm:$0xff]  }
 0x59b   :  { %2424 = vmatprep.subr.bf16.mxu0 %v2375_v63  ;;  %2476 = vmatpush1.bf16.msra.mxu1 %v2372_v8  ;;  %v3441_v63 = vld [vmem:[%s3905_s8 + $0x38] sm:$0xff]   ;;  %v3432_v8 = vld [vmem:[%s3905_s8 + $0x48] sm:$0xff]  }
 0x59c   :  { %2477 = vmatprep.subr.bf16.mxu1 %v2377_v0  ;;  %v3433_v0 = vld [vmem:[%s3905_s8 + $0x50] sm:$0xff]  }
 0x59e   :  { %2425 = vmatpush1.bf16.msra.mxu0 %v2374_v1  ;;  %v3434_v1 = vld [vmem:[%s3905_s8 + $0x58] sm:$0xff]  }
 0x59f   :  { %2426 = vmatprep.subr.bf16.mxu0 %v2379_v2  ;;  %2478 = vmatpush1.bf16.msra.mxu1 %v2376_v3  ;;  %v3436_v2 = vld [vmem:[%s3905_s8 + $0x60] sm:$0xff]   ;;  %v3438_v3 = vld [vmem:[%s3905_s8 + $0x68] sm:$0xff]  }
 0x5a0   :  { %2479 = vmatprep.subr.bf16.mxu1 %v2381_v5  ;;  %v3440_v5 = vld [vmem:[%s3905_s8 + $0x70] sm:$0xff]  }
 0x5a2   :  { %2427 = vmatpush1.bf16.msra.mxu0 %v2378_v6  ;;  %v3442_v6 = vld [vmem:[%s3905_s8 + $0x78] sm:$0xff]  }
 0x5a3   :  { %2428 = vmatprep.subr.bf16.mxu0 %v2383_v59  ;;  %2480 = vmatpush1.bf16.msra.mxu1 %v2380_v9 }
 0x5a4   :  { %2481 = vmatprep.subr.bf16.mxu1 %v2385_v10 }
 0x5a6   :  { %2429 = vmatpush1.bf16.msra.mxu0 %v2382_v11 }
 0x5a7   :  { %2430 = vmatprep.subr.bf16.mxu0 %v2387_v13  ;;  %2482 = vmatpush1.bf16.msra.mxu1 %v2384_v15 }
 0x5a8   :  { %2483 = vmatprep.subr.bf16.mxu1 %v2389_v16 }
 0x5aa   :  { %2431 = vmatpush1.bf16.msra.mxu0 %v2386_v17 }
 0x5ab   :  { %2432 = vmatprep.subr.bf16.mxu0 %v2391_v18  ;;  %2484 = vmatpush1.bf16.msra.mxu1 %v2388_v19  ;;  %v3262_v19 = vld [vmem:[%s3906_s9] ss:$0 sm:$0xff] }
 0x5ac   :  { %2485 = vmatprep.subr.bf16.mxu1 %v2393_v20 }
 0x5ae   :  { %2433 = vmatpush1.bf16.msra.mxu0 %v2390_v21 }
 0x5af   :  { %2434 = vmatprep.subr.bf16.mxu0 %v2395_v24  ;;  %2486 = vmatpush1.bf16.msra.mxu1 %v2392_v26 }
 0x5b0   :  { %2487 = vmatprep.subr.bf16.mxu1 %v2397_v30 }
 0x5b2   :  { %2435 = vmatpush1.bf16.msra.mxu0 %v2394_v7 }
 0x5b3   :  { %2436 = vmatprep.subr.bf16.mxu0 %v2399_v12  ;;  %2488 = vmatpush1.bf16.msra.mxu1 %v2396_v31 }
 0x5b4   :  { %2489 = vmatprep.subr.bf16.mxu1 %v2401_v32 }
 0x5b6   :  { %2437 = vmatpush1.bf16.msra.mxu0 %v2398_v33 }
 0x5b7   :  { %2490 = vmatpush1.bf16.msra.mxu1 %v2400_v34 }
 0x5b9   :  { %2439 = vmatmul.mubr.bf16.vlgmr.msra.gmra.mrb[28].mxu0 %v2402_v35 }
 0x5ba   :  { %2448 = vmatprep.mubr.bf16.mxu0 %v2405_v36  ;;  %2492 = vmatmul.mubr.bf16.vlgmr.msra.gmra.mrb[32].mxu1 %v2402_v35 }
 0x5bb   :  { %2501 = vmatprep.mubr.bf16.mxu1 %v2405_v36 }
 0x5c1   :  { %2449 = vmatmul.mubr.bf16.gmra.mrb[32].mxu0 %v2404_v40 }
 0x5c2   :  { %2502 = vmatmul.mubr.bf16.gmra.mrb[36].mxu1 %v2404_v40  ;;  %3305 = vmatprep.mubr.msk.bf16.mxu0 %vm224_vm0, %v3427_v23 }
 0x5c3   :  { %3293 = vmatprep.mubr.msk.bf16.mxu1 %vm224_vm0, %v3435_v4 }
 0x68c   :  { %v2440_v61 = vpop.f32.mrb[28].mxu0 }
 0x68d   :  { %v2442_v25 = vpop.f32.mrb[29].mxu0  ;;  %v2493_v29 = vpop.f32.mrb[32].mxu1 }
 0x68e   :  { %v2444_v28 = vpop.f32.mrb[30].mxu0  ;;  %v2495_v14 = vpop.f32.mrb[33].mxu1 }
 0x68f   :  { %v2512_v22 = vpack.c.bf16 %v2444_v28, %v2440_v61  ;;  %v2446_v27 = vpop.f32.mrb[31].mxu0  ;;  %v2497_v44 = vpop.f32.mrb[34].mxu1 }
 0x690   :  { %v2513_v45 = vpack.c.bf16 %v2446_v27, %v2442_v25  ;;  %v2514_v46 = vpack.c.bf16 %v2497_v44, %v2493_v29  ;;  %v2499_v47 = vpop.f32.mrb[35].mxu1 }
 0x691   :  { %3301 = vmatprep.subr.bf16.mxu0 %v2512_v22  ;;  %v2515_v48 = vpack.c.bf16 %v2499_v47, %v2495_v14 }
 0x692   :  { %3289 = vmatprep.subr.bf16.mxu1 %v2513_v45  ;;  %3302 = vmatpush3.bf16.msra.mxu0 %v2512_v22 }
 0x693   :  { %3290 = vmatpush3.bf16.msra.mxu1 %v2513_v45 }
 0x694   :  { %v2450_v37 = vpop.f32.mrb[32].mxu0 }
 0x695   :  { %v2452_v38 = vpop.f32.mrb[33].mxu0  ;;  %v2503_v39 = vpop.f32.mrb[36].mxu1 }
 0x696   :  { %v2454_v41 = vpop.f32.mrb[34].mxu0  ;;  %v2505_v42 = vpop.f32.mrb[37].mxu1 }
 0x697   :  { %v2516_v43 = vpack.c.bf16 %v2454_v41, %v2450_v37  ;;  %v2456_v49 = vpop.f32.mrb[35].mxu0  ;;  %v2507_v50 = vpop.f32.mrb[38].mxu1 }
 0x698   :  { %v2517_v51 = vpack.c.bf16 %v2456_v49, %v2452_v38  ;;  %v2518_v52 = vpack.c.bf16 %v2507_v50, %v2503_v39  ;;  %v2509_v53 = vpop.f32.mrb[39].mxu1 }
 0x699   :  { %3303 = vmatprep.subr.bf16.mxu0 %v2516_v43  ;;  %v2519_v55 = vpack.c.bf16 %v2509_v53, %v2505_v42 }
 0x69a   :  { %3291 = vmatprep.subr.bf16.mxu1 %v2517_v51  ;;  %3304 = vmatpush3.bf16.msra.mxu0 %v2516_v43 }
 0x69b   :  { %3292 = vmatpush3.bf16.msra.mxu1 %v2517_v51  ;;  %3313 = vmatprep.subr.bf16.mxu0 %v2514_v46 }
 0x69d   :  { %3306 = vmatmul.mubr.msk.bf16.vlgmr.msra.gmra.mrb[36].mxu0 %vm224_vm0, %v3428_v54 }
 0x69e   :  { %3314 = vmatpush3.bf16.msra.mxu0 %v2514_v46  ;;  %3309 = vmatprep.mubr.msk.bf16.mxu0 %vm224_vm0, %v3429_v56 }
 0x69f   :  { %3315 = vmatprep.subr.bf16.mxu0 %v2518_v52  ;;  %3294 = vmatmul.mubr.msk.bf16.vlgmr.msra.gmra.mrb[40].mxu1 %vm224_vm0, %v3437_v57 }
 0x6a0   :  { %3297 = vmatprep.mubr.msk.bf16.mxu1 %vm224_vm0, %v3439_v58 }
 0x6a2   :  { %3316 = vmatpush3.bf16.msra.mxu0 %v2518_v52 }
 0x6a3   :  { %3325 = vmatprep.subr.bf16.mxu0 %v2515_v48 }
 0x6a5   :  { %3310 = vmatmul.mubr.msk.bf16.gmra.mrb[40].mxu0 %vm224_vm0, %v3430_v60 }
 0x6a6   :  { %3317 = vmatprep.mubr.msk.bf16.mxu0 %vm224_vm0, %v3431_v62 }
 0x6a7   :  { %3298 = vmatmul.mubr.msk.bf16.gmra.mrb[44].mxu1 %vm224_vm0, %v3441_v63 }
 0x6ad   :  { %3318 = vmatmul.mubr.msk.bf16.vlgmr.msra.gmra.mrb[36].mxu0 %vm224_vm0, %v3432_v8 }
 0x6ae   :  { %3326 = vmatpush3.bf16.msra.mxu0 %v2515_v48  ;;  %3321 = vmatprep.mubr.msk.bf16.mxu0 %vm224_vm0, %v3433_v0 }
 0x6af   :  { %3327 = vmatprep.subr.bf16.mxu0 %v2519_v55 }
 0x6b2   :  { %3328 = vmatpush3.bf16.msra.mxu0 %v2519_v55 }
 0x6b5   :  { %3322 = vmatmul.mubr.msk.bf16.gmra.mrb[40].mxu0 %vm224_vm0, %v3434_v1 }
 0x6b6   :  { %3329 = vmatprep.mubr.msk.bf16.mxu0 %vm224_vm0, %v3436_v2 }
 0x6bd   :  { %3330 = vmatmul.mubr.msk.bf16.vlgmr.msra.gmra.mrb[36].mxu0 %vm224_vm0, %v3438_v3 }
 0x6be   :  { %3333 = vmatprep.mubr.msk.bf16.mxu0 %vm224_vm0, %v3440_v5 }
 0x6c5   :  { %3334 = vmatmul.mubr.msk.bf16.gmra.mrb[40].mxu0 %vm224_vm0, %v3442_v6 }
 0x772   :  { %v3295_v59 = vpop.f32.mrb[40].mxu1 }
 0x773   :  { %v2603_v9 = vpop.f32.mrb[41].mxu1 }
 0x774   :  { %v3296_v10 = vpop.f32.mrb[42].mxu1 }
 0x775   :  { %v2606_v11 = vpop.f32.mrb[43].mxu1 }
 0x77a   :  { %v3299_v13 = vpop.f32.mrb[44].mxu1 }
 0x77b   :  { %v2619_v15 = vpop.f32.mrb[45].mxu1 }
 0x77c   :  { %v3300_v16 = vpop.f32.mrb[46].mxu1 }
 0x77d   :  { %v2622_v17 = vpop.f32.mrb[47].mxu1 }
 0x790   :  { %v3331_v18 = vpop.f32.mrb[36].mxu0 }
 0x791   :  { %v3337_v20 = vadd.f32 %v3331_v18, %v3295_v59  ;;  %v2920_v21 = vpop.f32.mrb[37].mxu0 }
 0x792   :  { %v3338_v24 = vadd.f32 %v2920_v21, %v2603_v9  ;;  %v3332_v26 = vpop.f32.mrb[38].mxu0 }
 0x793   :  { %v2968_v30 = vadd.f32 %v3337_v20, %v3262_v19  ;;  %v3339_v7 = vadd.f32 %v3332_v26, %v3296_v10  ;;  %v2923_v12 = vpop.f32.mrb[39].mxu0 }
 0x794   :  { %v2966_v31 = vadd.f32 %v3338_v24, %v3262_v19  ;;  %v3340_v32 = vadd.f32 %v2923_v12, %v2606_v11 }
 0x795   :  { %3443 = vtanh.f32 %v2968_v30  ;;  %v2969_v33 = vadd.f32 %v3339_v7, %v3262_v19 }
 0x796   :  { %3445 = vtanh.f32 %v2966_v31  ;;  %v2967_v34 = vadd.f32 %v3340_v32, %v3262_v19 }
 0x797   :  { %3447 = vtanh.f32 %v2969_v33 }
 0x798   :  { %3449 = vtanh.f32 %v2967_v34  ;;  %v3335_v35 = vpop.f32.mrb[40].mxu0 }
 0x799   :  { %v3341_v36 = vadd.f32 %v3335_v35, %v3299_v13  ;;  %v2936_v40 = vpop.f32.mrb[41].mxu0 }
 0x79a   :  { %v3342_v23 = vadd.f32 %v2936_v40, %v2619_v15  ;;  %v3336_v4 = vpop.f32.mrb[42].mxu0 }
 0x79b   :  { %v2972_v61 = vadd.f32 %v3341_v36, %v3262_v19  ;;  %v3343_v25 = vadd.f32 %v3336_v4, %v3300_v16  ;;  %v2939_v29 = vpop.f32.mrb[43].mxu0 }
 0x79c   :  { %v2970_v28 = vadd.f32 %v3342_v23, %v3262_v19  ;;  %v3344_v14 = vadd.f32 %v2939_v29, %v2622_v17 }
 0x79d   :  { %3451 = vtanh.f32 %v2972_v61  ;;  %v2973_v22 = vadd.f32 %v3343_v25, %v3262_v19 }
 0x79e   :  { %3453 = vtanh.f32 %v2970_v28  ;;  %v2971_v27 = vadd.f32 %v3344_v14, %v3262_v19 }
 0x79f   :  { %v3444_v44 = vpop.eup %3443  ;;  %3455 = vtanh.f32 %v2973_v22 }
 0x7a0   :  { %v3446_v45 = vpop.eup %3445  ;;  %2984 = vst [vmem:[%s3909_s12 + $0x10] sm:$0xff] %v3444_v44  ;;  %3457 = vtanh.f32 %v2971_v27 }
 0x7a1   :  { %v3448_v46 = vpop.eup %3447  ;;  %2982 = vst [vmem:[%s3909_s12] sm:$0xff] %v3446_v45 }
 0x7a2   :  { %v3450_v47 = vpop.eup %3449  ;;  %2985 = vst [vmem:[%s3909_s12 + $0x18] sm:$0xff] %v3448_v46 }
 0x7a3   :  { %2983 = vst [vmem:[%s3909_s12 + $0x8] sm:$0xff] %v3450_v47 }
 0x7a7   :  { %v3452_v48 = vpop.eup %3451 }
 0x7a8   :  { %v3454_v37 = vpop.eup %3453  ;;  %2988 = vst [vmem:[%s3909_s12 + $0x30] sm:$0xff] %v3452_v48 }
 0x7a9   :  { %v3456_v38 = vpop.eup %3455  ;;  %2986 = vst [vmem:[%s3909_s12 + $0x20] sm:$0xff] %v3454_v37 }
 0x7aa   :  { %v3458_v39 = vpop.eup %3457  ;;  %2989 = vst [vmem:[%s3909_s12 + $0x38] sm:$0xff] %v3456_v38 }
 0x7ab   :  { %2987 = vst [vmem:[%s3909_s12 + $0x28] sm:$0xff] %v3458_v39 }
 0x7ac   :  { %2994 = vsyncpa [#allocation6], 1 }
 0x7ad   :  { %2995 = vsyncmov [#allocation4] }
 0x7b0   :  { %s2996_s0 = vpop.sfrf %2995 }
 0x7b1   :  { %p3263_p8 = scmp.ne.s32.totalorder %s2996_s0, 0 }
 0x7b3   :  { %3000 = shalt.err (%p3263_p8)  }
 0x7b4   :  { %3002 = vsyncmov [#allocation4 + $0x1] }
 0x7b7   :  { %s3003_s11 = vpop.sfrf %3002 }
 0x7b8   :  { %p3264_p9 = scmp.ne.s32.totalorder %s3003_s11, 0 }
 0x7ba   :  { %3007 = shalt.err (%p3264_p9)  }

</bundles_post_ra>
